<compile_context>
chip_gen: v7x
topology: tpu7x:2x2x1
jax: 0.10.0
libtpu: 0.0.40
codegen_flags: <defaults>
</compile_context>

<pallas_src>
import jax
import jax.numpy as jnp
from jax import lax
from jax.experimental import pallas as pl
from jax.experimental.pallas import tpu as pltpu


# ----------------------------------------------------------------------------
# Glue: maxpool(2), up conv (1->C, 1x1), query/key 1x1 convs, torch-style views
# ----------------------------------------------------------------------------
def _preprocess(fa, fb, params):
    B, C, H, W = fa.shape
    HW = H * W
    H2, W2 = H // 2, W // 2
    hp = lax.Precision.HIGHEST

    # nn.MaxPool2d(2)
    fbp = fb.reshape(B, 1, H2, 2, W2, 2).max(axis=(3, 5))            # (B,1,H2,W2)
    # self.up = Conv2d(1, C, 1)
    fb_up = (fbp * params['w_up'].reshape(1, C, 1, 1)
             + params['b_up'].reshape(1, C, 1, 1))                   # (B,C,H2,W2)
    # query_conv / key_conv (1x1)
    qc = jnp.einsum('oc,bchw->bohw', params['w_q'], fb_up,
                    precision=hp) + params['b_q'][None, :, None, None]
    kc = jnp.einsum('oc,bchw->bohw', params['w_k'], fb_up,
                    precision=hp) + params['b_k'][None, :, None, None]

    Cq = params['w_q'].shape[0]
    assert (Cq * H2 * W2) % HW == 0, "module's .view(B,-1,H*W) must be valid"
    Kq = (Cq * H2 * W2) // HW
    q_nat = qc.reshape(B, Kq, HW)        # proj_query^T (before .permute)
    k_nat = kc.reshape(B, Kq, HW)        # proj_key
    fa_flat = fa.reshape(B, C, HW)
    return q_nat, k_nat, fa_flat


# ----------------------------------------------------------------------------
# Pallas kernel wrapper: attention + fc + residual + relu, tiled over query rows
# ----------------------------------------------------------------------------
def euga_pallas(fa, fb, params, *, block_q=128):
    # block_q: query-row tile size; 128 everywhere, 256-512 is better on
    # v5e/v6e at production HW (more VMEM), keep 128 on v7x (64 MiB VMEM).
    B, C, H, W = fa.shape
    HW = H * W
    hp = lax.Precision.HIGHEST

    q_nat, k_nat, fa_flat = _preprocess(fa, fb, params)
    Kq = q_nat.shape[1]

    # value_conv (1x1) hoisted out of the kernel; V^T is tile-invariant.
    v = (jnp.einsum('oc,bcj->boj', params['w_v'], fa_flat, precision=hp)
         + params['b_v'][None, :, None])                       # (B, C, HW) f32
    vt = jnp.transpose(v, (0, 2, 1)).astype(jnp.bfloat16)      # (B, HW, C)

    # energy path selection: VPU outer-product for tiny Kq, MXU otherwise.
    use_mxu_energy = Kq > 16
    if use_mxu_energy:
        KP = ((Kq + 15) // 16) * 16          # pad to bf16 sublane packing
        pad = ((0, 0), (0, KP - Kq), (0, 0))
        q_in = jnp.pad(q_nat, pad).transpose(0, 2, 1).astype(jnp.bfloat16)
        k_in = jnp.pad(k_nat, pad).astype(jnp.bfloat16)
    else:
        KP = Kq
        q_in = jnp.transpose(q_nat, (0, 2, 1))   # (B, HW, Kq) f32, lane-dense rows
        k_in = k_nat                             # (B, Kq, HW) f32

    fa2 = fa_flat.reshape(B * C, HW)                            # f32 residual
    wfct = jnp.transpose(params['w_fc']).astype(jnp.bfloat16)   # (HW_in, HW_out)
    bfc = params['b_fc'].reshape(1, HW)                         # (1, HW) f32

    # query-row tile size: multiple of 128 dividing HW (or the full HW).
    if HW % 128 == 0:
        tq = max(128, (min(block_q, HW) // 128) * 128)
        while HW % tq:
            tq -= 128
    else:
        tq = HW
    T = HW // tq

    def kernel(q_ref, k_ref, vt_ref, fa_ref, wfct_ref, bfc_ref,
               out_ref, slab_ref):
        t = pl.program_id(0)

        @pl.when(t == 0)
        def _init():
            out_ref[...] = jnp.zeros_like(out_ref)

        # Per-batch loop keeps in-flight temporaries to a single (tq, HW) slab.
        for b in range(B):
            q_b = q_ref[b]                      # (tq, KP)
            k_b = k_ref[b]                      # (KP, HW)
            if use_mxu_energy:
                energy = jnp.dot(q_b, k_b, preferred_element_type=jnp.float32)
            else:
                # VPU path: sum of Kq broadcasted outer products (no MXU).
                energy = q_b[:, 0:1] * k_b[0:1, :]
                for kk in range(1, KP):
                    energy = energy + q_b[:, kk:kk + 1] * k_b[kk:kk + 1, :]

            m = jnp.max(energy, axis=-1, keepdims=True)          # (tq, 1)
            p = jnp.exp(energy - m)                              # (tq, HW) f32
            inv_l = pl.reciprocal(jnp.sum(p, axis=-1, keepdims=True),
                                  approx=True)                   # (tq, 1)
            # attention-apply: p (tq,HW) @ V^T (HW,C) -> (tq,C); deferred norm.
            out_t = jnp.dot(p.astype(vt_ref.dtype), vt_ref[b],
                            preferred_element_type=jnp.float32) * inv_l
            # transpose only the tiny (tq, C) result; stage for the fc matmul.
            slab_ref[b * C:(b + 1) * C, :] = out_t.T.astype(slab_ref.dtype)

        # fc partial: (B*C, tq) @ (tq, HW), accumulated into the resident output.
        out_ref[...] += jnp.dot(slab_ref[...], wfct_ref[...],
                                preferred_element_type=jnp.float32)

        @pl.when(t == T - 1)
        def _finalize():
            res = out_ref[...] + bfc_ref[...] + fa_ref[...]
            out_ref[...] = jnp.maximum(res, 0.0)

    # rough VMEM budget (double-buffered inputs + in-body temporaries) + headroom
    q_bytes = 2 if use_mxu_energy else 4
    vmem_est = (
        2 * B * tq * max(KP, 128) * q_bytes   # q tiles (lane-padded)
        + 2 * B * KP * HW * q_bytes           # k (resident)
        + 2 * B * HW * C * 2                  # V^T (resident)
        + 2 * B * C * HW * 4                  # fa residual (resident)
        + 2 * tq * HW * 2                     # W_fc^T stream
        + 2 * HW * 4                          # b_fc
        + 2 * B * C * HW * 4                  # resident output accumulator
        + B * C * tq * 2                      # slab scratch
        + 3 * tq * HW * 4                     # energy / p / p_bf16 temporaries
    )
    vmem_limit = int(min(max(vmem_est * 3 // 2, 32 * 1024 * 1024),
                         96 * 1024 * 1024))

    out2 = pl.pallas_call(
        kernel,
        out_shape=jax.ShapeDtypeStruct((B * C, HW), jnp.float32),
        grid_spec=pltpu.PrefetchScalarGridSpec(
            num_scalar_prefetch=0,
            grid=(T,),
            in_specs=[
                pl.BlockSpec((B, tq, KP), lambda t: (0, t, 0)),   # q tile (stream)
                pl.BlockSpec((B, KP, HW), lambda t: (0, 0, 0)),   # k (resident)
                pl.BlockSpec((B, HW, C), lambda t: (0, 0, 0)),    # V^T (resident)
                pl.BlockSpec((B * C, HW), lambda t: (0, 0)),      # fa (resident)
                pl.BlockSpec((tq, HW), lambda t: (t, 0)),         # W_fc^T stream
                pl.BlockSpec((1, HW), lambda t: (0, 0)),          # b_fc
            ],
            out_specs=pl.BlockSpec((B * C, HW), lambda t: (0, 0)),
            scratch_shapes=[
                pltpu.VMEM((B * C, tq), jnp.bfloat16),  # per-tile fc LHS staging
            ],
        ),
        compiler_params=pltpu.CompilerParams(
            dimension_semantics=("arbitrary",),
            vmem_limit_bytes=vmem_limit,
        ),
    )(q_in, k_in, vt, fa2, wfct, bfc)

    return out2.reshape(B, C, H, W)


# ----------------------------------------------------------------------------
# Pure-JAX reference (mirrors the PyTorch forward)
# ----------------------------------------------------------------------------
def euga_reference(fa, fb, params):
    B, C, H, W = fa.shape
    hp = lax.Precision.HIGHEST
    q, k, fa_flat = _preprocess(fa, fb, params)
    energy = jnp.einsum('bki,bkj->bij', q, k, precision=hp)          # (B,HW,HW)
    attention = jax.nn.softmax(energy, axis=-1)
    v = (jnp.einsum('oc,bcj->boj', params['w_v'], fa_flat, precision=hp)
         + params['b_v'][None, :, None])                             # (B,C,HW)
    out = jnp.einsum('bcj,bij->bci', v, attention, precision=hp)     # (B,C,HW)
    out = (jnp.einsum('bcj,ij->bci', out, params['w_fc'], precision=hp)
           + params['b_fc'][None, None, :])
    out = out.reshape(B, C, H, W) + fa
    return jnp.maximum(out, 0.0)


# ----------------------------------------------------------------------------
# Deterministic parameter init (shapes from EUGA.__init__; gamma/bn unused)
# ----------------------------------------------------------------------------
def init_params(key, C, Cq, HW):
    ks = jax.random.split(key, 10)
    s = 0.1
    return {
        'w_up': jax.random.normal(ks[0], (C, 1), jnp.float32) * s,      # Conv2d(1, C, 1)
        'b_up': jax.random.normal(ks[1], (C,), jnp.float32) * s,
        'w_q': jax.random.normal(ks[2], (Cq, C), jnp.float32) * s,      # query_conv
        'b_q': jax.random.normal(ks[3], (Cq,), jnp.float32) * s,
        'w_k': jax.random.normal(ks[4], (Cq, C), jnp.float32) * s,      # key_conv
        'b_k': jax.random.normal(ks[5], (Cq,), jnp.float32) * s,
        'w_v': jax.random.normal(ks[6], (C, C), jnp.float32) * s,       # value_conv
        'b_v': jax.random.normal(ks[7], (C,), jnp.float32) * s,
        'w_fc': jax.random.normal(ks[8], (HW, HW), jnp.float32) * (s / (HW ** 0.5)),
        'b_fc': jax.random.normal(ks[9], (HW,), jnp.float32) * s,
    }


if __name__ == "__main__":
    # C = 16 so out_channel = C // 4 = 4 and the module's .view(B, -1, H*W) works.
    B, C, H, W = 2, 16, 16, 16
    Cq = max(C // 4, 1)
    HW = H * W

    key = jax.random.PRNGKey(0)
    kfa, kfb, kp = jax.random.split(key, 3)
    fa = jax.random.normal(kfa, (B, C, H, W), jnp.float32)   # input
    fb = jax.random.normal(kfb, (B, 1, H, W), jnp.float32)   # uncertainty map
    params = init_params(kp, C, Cq, HW)

    out = euga_pallas(fa, fb, params)        # HW=256 -> tq=128, T=2 fc-accum tiles
    out = jax.block_until_ready(out)

    ref = euga_reference(fa, fb, params)
    assert out.shape == (B, C, H, W)
    err = float(jnp.max(jnp.abs(out - ref)))
    if err < 1e-2:
        print("KERNEL_OK")
    else:
        print(f"MISMATCH max_abs_err={err}")
</pallas_src>

<mosaic_0001>
module attributes {stable_mosaic.version = 11 : i64} {
  func.func @kernel(%arg0: i32, %arg1: memref<2x128x1xf32, #tpu.memory_space<vmem>>, %arg2: memref<2x1x256xf32, #tpu.memory_space<vmem>>, %arg3: memref<2x256x16xbf16, #tpu.memory_space<vmem>>, %arg4: memref<32x256xf32, #tpu.memory_space<vmem>>, %arg5: memref<128x256xbf16, #tpu.memory_space<vmem>>, %arg6: memref<1x256xf32, #tpu.memory_space<vmem>>, %arg7: memref<32x256xf32, #tpu.memory_space<vmem>>, %arg8: memref<32x128xbf16, #tpu.memory_space<vmem>>) attributes {dimension_semantics = [#tpu.dimension_semantics<arbitrary>], iteration_bounds = array<i64: 2>, scalar_prefetch = 0 : i64, scratch_operands = 1 : i64, tpu.core_type = #tpu.core_type<tc>, window_params = [{transform_indices = @transform_0, window_bounds = array<i64: 2, 128, 1>}, {pipeline_mode = #tpu.pipeline_mode<synchronous>, transform_indices = @transform_1, window_bounds = array<i64: 2, 1, 256>}, {pipeline_mode = #tpu.pipeline_mode<synchronous>, transform_indices = @transform_2, window_bounds = array<i64: 2, 256, 16>}, {pipeline_mode = #tpu.pipeline_mode<synchronous>, transform_indices = @transform_3, window_bounds = array<i64: 32, 256>}, {transform_indices = @transform_4, window_bounds = array<i64: 128, 256>}, {pipeline_mode = #tpu.pipeline_mode<synchronous>, transform_indices = @transform_5, window_bounds = array<i64: 1, 256>}, {pipeline_mode = #tpu.pipeline_mode<synchronous>, transform_indices = @transform_6, window_bounds = array<i64: 32, 256>}]} {
    %c0_i32 = arith.constant 0 : i32
    %0 = arith.cmpi eq, %arg0, %c0_i32 : i32
    %1 = arith.extui %0 : i1 to i32
    %c0_i32_0 = arith.constant 0 : i32
    %2 = arith.cmpi ne, %1, %c0_i32_0 : i32
    scf.if %2 {
      %cst_35 = arith.constant 0.000000e+00 : f32
      %60 = vector.broadcast %cst_35 : f32 to vector<32x256xf32>
      %c0_36 = arith.constant 0 : index
      %c0_37 = arith.constant 0 : index
      %61 = vector.load %arg7[%c0_36, %c0_37] : memref<32x256xf32, #tpu.memory_space<vmem>>, vector<32x256xf32>
      tpu.vector_store %arg7[%c0_36, %c0_37], %60 {strides = array<i32>} : memref<32x256xf32, #tpu.memory_space<vmem>>, vector<32x256xf32>,
    } else {
    }
    %c0 = arith.constant 0 : index
    %c0_1 = arith.constant 0 : index
    %c0_2 = arith.constant 0 : index
    %3 = vector.load %arg1[%c0, %c0_1, %c0_2] : memref<2x128x1xf32, #tpu.memory_space<vmem>>, vector<1x128x1xf32>
    %4 = vector.shape_cast %3 : vector<1x128x1xf32> to vector<128x1xf32>
    %c0_3 = arith.constant 0 : index
    %c0_4 = arith.constant 0 : index
    %c0_5 = arith.constant 0 : index
    %5 = vector.load %arg2[%c0_3, %c0_4, %c0_5] : memref<2x1x256xf32, #tpu.memory_space<vmem>>, vector<1x1x256xf32>
    %6 = vector.shape_cast %5 : vector<1x1x256xf32> to vector<1x256xf32>
    %7 = vector.broadcast %4 : vector<128x1xf32> to vector<128x256xf32>
    %8 = vector.broadcast %6 : vector<1x256xf32> to vector<128x256xf32>
    %9 = arith.mulf %7, %8 : vector<128x256xf32>
    %cst = arith.constant dense<0xFF800000> : vector<128xf32>
    %10 = vector.multi_reduction <maximumf>, %9, %cst [1] : vector<128x256xf32> to vector<128xf32>
    %11 = vector.shape_cast %10 : vector<128xf32> to vector<128x1xf32>
    %12 = vector.broadcast %11 : vector<128x1xf32> to vector<128x256xf32>
    %13 = arith.subf %9, %12 : vector<128x256xf32>
    %14 = math.exp %13 : vector<128x256xf32>
    %cst_6 = arith.constant dense<0.000000e+00> : vector<128xf32>
    %15 = vector.multi_reduction <add>, %14, %cst_6 [1] : vector<128x256xf32> to vector<128xf32>
    %16 = vector.shape_cast %15 : vector<128xf32> to vector<128x1xf32>
    %17 = tpu.reciprocal %16 {approx = true} : vector<128x1xf32> -> vector<128x1xf32>
    %18 = arith.truncf %14 : vector<128x256xf32> to vector<128x256xbf16>
    %c0_7 = arith.constant 0 : index
    %c0_8 = arith.constant 0 : index
    %c0_9 = arith.constant 0 : index
    %19 = vector.load %arg3[%c0_7, %c0_8, %c0_9] : memref<2x256x16xbf16, #tpu.memory_space<vmem>>, vector<1x256x16xbf16>
    %20 = vector.shape_cast %19 : vector<1x256x16xbf16> to vector<256x16xbf16>
    %cst_10 = arith.constant dense<0.000000e+00> : vector<128x16xf32>
    %21 = tpu.matmul %18, %20, %cst_10 {dimension_numbers = #tpu.dot_dimension_numbers<[1], [0], [0], [1], [0, 0, 1, 1], [], []>} : vector<128x256xbf16>, vector<256x16xbf16>, vector<128x16xf32> -> vector<128x16xf32>
    %22 = vector.broadcast %17 : vector<128x1xf32> to vector<128x16xf32>
    %23 = arith.mulf %21, %22 : vector<128x16xf32>
    %24 = tpu.transpose %23, [1, 0] : vector<128x16xf32> -> vector<16x128xf32>
    %25 = arith.truncf %24 : vector<16x128xf32> to vector<16x128xbf16>
    %c0_11 = arith.constant 0 : index
    %c0_12 = arith.constant 0 : index
    %26 = vector.load %arg8[%c0_11, %c0_12] : memref<32x128xbf16, #tpu.memory_space<vmem>>, vector<16x128xbf16>
    tpu.vector_store %arg8[%c0_11, %c0_12], %25 {strides = array<i32>} : memref<32x128xbf16, #tpu.memory_space<vmem>>, vector<16x128xbf16>,
    %c1 = arith.constant 1 : index
    %c0_13 = arith.constant 0 : index
    %c0_14 = arith.constant 0 : index
    %27 = vector.load %arg1[%c1, %c0_13, %c0_14] : memref<2x128x1xf32, #tpu.memory_space<vmem>>, vector<1x128x1xf32>
    %28 = vector.shape_cast %27 : vector<1x128x1xf32> to vector<128x1xf32>
    %c1_15 = arith.constant 1 : index
    %c0_16 = arith.constant 0 : index
    %c0_17 = arith.constant 0 : index
    %29 = vector.load %arg2[%c1_15, %c0_16, %c0_17] : memref<2x1x256xf32, #tpu.memory_space<vmem>>, vector<1x1x256xf32>
    %30 = vector.shape_cast %29 : vector<1x1x256xf32> to vector<1x256xf32>
    %31 = vector.broadcast %28 : vector<128x1xf32> to vector<128x256xf32>
    %32 = vector.broadcast %30 : vector<1x256xf32> to vector<128x256xf32>
    %33 = arith.mulf %31, %32 : vector<128x256xf32>
    %cst_18 = arith.constant dense<0xFF800000> : vector<128xf32>
    %34 = vector.multi_reduction <maximumf>, %33, %cst_18 [1] : vector<128x256xf32> to vector<128xf32>
    %35 = vector.shape_cast %34 : vector<128xf32> to vector<128x1xf32>
    %36 = vector.broadcast %35 : vector<128x1xf32> to vector<128x256xf32>
    %37 = arith.subf %33, %36 : vector<128x256xf32>
    %38 = math.exp %37 : vector<128x256xf32>
    %cst_19 = arith.constant dense<0.000000e+00> : vector<128xf32>
    %39 = vector.multi_reduction <add>, %38, %cst_19 [1] : vector<128x256xf32> to vector<128xf32>
    %40 = vector.shape_cast %39 : vector<128xf32> to vector<128x1xf32>
    %41 = tpu.reciprocal %40 {approx = true} : vector<128x1xf32> -> vector<128x1xf32>
    %42 = arith.truncf %38 : vector<128x256xf32> to vector<128x256xbf16>
    %c1_20 = arith.constant 1 : index
    %c0_21 = arith.constant 0 : index
    %c0_22 = arith.constant 0 : index
    %43 = vector.load %arg3[%c1_20, %c0_21, %c0_22] : memref<2x256x16xbf16, #tpu.memory_space<vmem>>, vector<1x256x16xbf16>
    %44 = vector.shape_cast %43 : vector<1x256x16xbf16> to vector<256x16xbf16>
    %cst_23 = arith.constant dense<0.000000e+00> : vector<128x16xf32>
    %45 = tpu.matmul %42, %44, %cst_23 {dimension_numbers = #tpu.dot_dimension_numbers<[1], [0], [0], [1], [0, 0, 1, 1], [], []>} : vector<128x256xbf16>, vector<256x16xbf16>, vector<128x16xf32> -> vector<128x16xf32>
    %46 = vector.broadcast %41 : vector<128x1xf32> to vector<128x16xf32>
    %47 = arith.mulf %45, %46 : vector<128x16xf32>
    %48 = tpu.transpose %47, [1, 0] : vector<128x16xf32> -> vector<16x128xf32>
    %49 = arith.truncf %48 : vector<16x128xf32> to vector<16x128xbf16>
    %c16 = arith.constant 16 : index
    %c0_24 = arith.constant 0 : index
    %50 = vector.load %arg8[%c16, %c0_24] : memref<32x128xbf16, #tpu.memory_space<vmem>>, vector<16x128xbf16>
    tpu.vector_store %arg8[%c16, %c0_24], %49 {strides = array<i32>} : memref<32x128xbf16, #tpu.memory_space<vmem>>, vector<16x128xbf16>,
    %c0_25 = arith.constant 0 : index
    %c0_26 = arith.constant 0 : index
    %51 = vector.load %arg7[%c0_25, %c0_26] : memref<32x256xf32, #tpu.memory_space<vmem>>, vector<32x256xf32>
    %c0_27 = arith.constant 0 : index
    %c0_28 = arith.constant 0 : index
    %52 = vector.load %arg8[%c0_27, %c0_28] : memref<32x128xbf16, #tpu.memory_space<vmem>>, vector<32x128xbf16>
    %c0_29 = arith.constant 0 : index
    %c0_30 = arith.constant 0 : index
    %53 = vector.load %arg5[%c0_29, %c0_30] : memref<128x256xbf16, #tpu.memory_space<vmem>>, vector<128x256xbf16>
    %cst_31 = arith.constant dense<0.000000e+00> : vector<32x256xf32>
    %54 = tpu.matmul %52, %53, %cst_31 {dimension_numbers = #tpu.dot_dimension_numbers<[1], [0], [0], [1], [0, 0, 1, 1], [], []>} : vector<32x128xbf16>, vector<128x256xbf16>, vector<32x256xf32> -> vector<32x256xf32>
    %55 = arith.addf %51, %54 : vector<32x256xf32>
    %c0_32 = arith.constant 0 : index
    %c0_33 = arith.constant 0 : index
    %56 = vector.load %arg7[%c0_32, %c0_33] : memref<32x256xf32, #tpu.memory_space<vmem>>, vector<32x256xf32>
    tpu.vector_store %arg7[%c0_32, %c0_33], %55 {strides = array<i32>} : memref<32x256xf32, #tpu.memory_space<vmem>>, vector<32x256xf32>,
    %c1_i32 = arith.constant 1 : i32
    %57 = arith.cmpi eq, %arg0, %c1_i32 : i32
    %58 = arith.extui %57 : i1 to i32
    %c0_i32_34 = arith.constant 0 : i32
    %59 = arith.cmpi ne, %58, %c0_i32_34 : i32
    scf.if %59 {
      %c0_35 = arith.constant 0 : index
      %c0_36 = arith.constant 0 : index
      %60 = vector.load %arg7[%c0_35, %c0_36] : memref<32x256xf32, #tpu.memory_space<vmem>>, vector<32x256xf32>
      %c0_37 = arith.constant 0 : index
      %c0_38 = arith.constant 0 : index
      %61 = vector.load %arg6[%c0_37, %c0_38] : memref<1x256xf32, #tpu.memory_space<vmem>>, vector<1x256xf32>
      %62 = vector.broadcast %61 : vector<1x256xf32> to vector<32x256xf32>
      %63 = arith.addf %60, %62 : vector<32x256xf32>
      %c0_39 = arith.constant 0 : index
      %c0_40 = arith.constant 0 : index
      %64 = vector.load %arg4[%c0_39, %c0_40] : memref<32x256xf32, #tpu.memory_space<vmem>>, vector<32x256xf32>
      %65 = arith.addf %63, %64 : vector<32x256xf32>
      %cst_41 = arith.constant 0.000000e+00 : f32
      %66 = vector.broadcast %cst_41 : f32 to vector<32x256xf32>
      %67 = arith.maximumf %65, %66 : vector<32x256xf32>
      %c0_42 = arith.constant 0 : index
      %c0_43 = arith.constant 0 : index
      %68 = vector.load %arg7[%c0_42, %c0_43] : memref<32x256xf32, #tpu.memory_space<vmem>>, vector<32x256xf32>
      tpu.vector_store %arg7[%c0_42, %c0_43], %67 {strides = array<i32>} : memref<32x256xf32, #tpu.memory_space<vmem>>, vector<32x256xf32>,
    } else {
    }
    return
  }
  func.func @transform_0(%arg0: i32) -> (i32, i32, i32) {
    %c0_i32 = arith.constant 0 : i32
    %c0_i32_0 = arith.constant 0 : i32
    %c0_i32_1 = arith.constant 0 : i32
    return %c0_i32, %arg0, %c0_i32_0 : i32, i32, i32
  }
  func.func @transform_1(%arg0: i32) -> (i32, i32, i32) {
    %c0_i32 = arith.constant 0 : i32
    %c0_i32_0 = arith.constant 0 : i32
    %c0_i32_1 = arith.constant 0 : i32
    %c0_i32_2 = arith.constant 0 : i32
    return %c0_i32, %c0_i32_0, %c0_i32_1 : i32, i32, i32
  }
  func.func @transform_2(%arg0: i32) -> (i32, i32, i32) {
    %c0_i32 = arith.constant 0 : i32
    %c0_i32_0 = arith.constant 0 : i32
    %c0_i32_1 = arith.constant 0 : i32
    %c0_i32_2 = arith.constant 0 : i32
    return %c0_i32, %c0_i32_0, %c0_i32_1 : i32, i32, i32
  }
  func.func @transform_3(%arg0: i32) -> (i32, i32) {
    %c0_i32 = arith.constant 0 : i32
    %c0_i32_0 = arith.constant 0 : i32
    %c0_i32_1 = arith.constant 0 : i32
    return %c0_i32, %c0_i32_0 : i32, i32
  }
  func.func @transform_4(%arg0: i32) -> (i32, i32) {
    %c0_i32 = arith.constant 0 : i32
    %c0_i32_0 = arith.constant 0 : i32
    return %arg0, %c0_i32 : i32, i32
  }
  func.func @transform_5(%arg0: i32) -> (i32, i32) {
    %c0_i32 = arith.constant 0 : i32
    %c0_i32_0 = arith.constant 0 : i32
    %c0_i32_1 = arith.constant 0 : i32
    return %c0_i32, %c0_i32_0 : i32, i32
  }
  func.func @transform_6(%arg0: i32) -> (i32, i32) {
    %c0_i32 = arith.constant 0 : i32
    %c0_i32_0 = arith.constant 0 : i32
    %c0_i32_1 = arith.constant 0 : i32
    return %c0_i32, %c0_i32_0 : i32, i32
  }
}

</mosaic_0001>

<bundles_post_ra>
// kernel: tpu_custom_call.1
= control target key start
LH: loop header
LB: loop body
LE: loop exit
PB: predicated region body
PF: predicated region fallthrough
CT: control target
= control target key end

     0   :  { %11 = vsyncpa [#allocation5], 0  ;;  %s2703_s21 = smov 0   ;;  %s2705_s22 = smov 0   ;;  %s3430_s0 = inlined_call_operand.vmem [shape: f32[2,256,1], index: 0, kind: input, shape index: {}]   ;;  %s3431_s1 = inlined_call_operand.vmem [shape: f32[2,1,256], index: 1, kind: input, shape index: {}]   ;;  %s3432_s2 = inlined_call_operand.vmem [shape: bf16[2,256,16], index: 2, kind: input, shape index: {}]   ;;  %s3433_s3 = inlined_call_operand.vmem [shape: f32[32,256], index: 3, kind: input, shape index: {}]   ;;  %s3434_s4 = inlined_call_operand.vmem [shape: bf16[256,256], index: 4, kind: input, shape index: {}]   ;;  %s3435_s5 = inlined_call_operand.vmem [shape: f32[1,256], index: 5, kind: input, shape index: {}]   ;;  %s3436_s6 = inlined_call_operand.hbm [shape: f32[32,256], index: 6, kind: output, shape index: {}]  }
   0x1   :  { %s2707_s23 = smov 0  }
   0x2 LB: > { %s2719_s24 = sadd.s32 4294967295, %s2661_s23   ;;  %s2722_s25 = sadd.s32 1, %s2661_s23   ;;  %s2661_s23 = sphi %s2707_s23, %s3493_s23   ;;  %s2657_s22 = sphi %s2705_s22, %s3492_s22   ;;  %s2653_s21 = sphi %s2703_s21, %s3491_s21  }
   0x3   : > { %s21_s26 = ssub.s32 %s2661_s23, %s2722_s25  ;;  %s24_s27 = sadd.s32 1, %s2657_s22 }
   0x4   : > { %p22_p0 = scmp.eq.s32.totalorder %s21_s26, 0  ;;  %p31_p1 = scmp.ne.s32.totalorder %s2657_s22, %s2653_s21 }
   0x5   : > { %p32_p2 = scmp.eq.s32.totalorder %s2661_s23, 0  ;;  %p2024_p4 = scmp.ge.s32.totalorder %s2661_s23, 2 }
   0x6   : > { %s2731_s28 = scalar_select %p22_p0, %s2657_s22, %s24_s27  }
   0x7   : > { %p33_p3 = por %p32_p2, %p31_p1  ;;  %200 = sbr.rel (%p2024_p4) target bundleno = 34 (0x22), region = 32 }
   0xe   : > { %203 = sbr.rel (!%p33_p3) target bundleno = 34 (0x22), region = 36  ;;  %s205_s29 = sand.u32 (%p33_p3), 1, %s2657_s22  }
   0xf   : > { %s2136_s30 = sshll.u32 (%p33_p3), %s2661_s23, 7  ;;  %s2025_s7 = sshll.u32 (%p33_p3), %s205_s29, 8 }
  0x10   : > { %s2739_s10 = scalar_lea.vmem (%p33_p3), %s3430_s0, %s2136_s30  ;;  %s2744_s11 = scalar_lea.vmem (%p33_p3), [#allocation3], %s2025_s7 }
  0x11   : > { %v300_v0 = vld [vmem:[%s2739_s10] sm:$0xff] (%p33_p3)  ;;  %v302_v1 = vld [vmem:[%s2739_s10 + $0x8] sm:$0xff] (%p33_p3)  ;;  %v304_v2 = vld [vmem:[%s2739_s10 + $0x10] sm:$0xff] (%p33_p3) }
  0x12   : > { %301 = vst [vmem:[%s2744_s11] sm:$0xff] (%p33_p3), %v300_v0  ;;  %303 = vst [vmem:[%s2744_s11 + $0x8] sm:$0xff] (%p33_p3), %v302_v1  ;;  %v306_v3 = vld [vmem:[%s2739_s10 + $0x18] sm:$0xff] (%p33_p3)  ;;  %v308_v4 = vld [vmem:[%s2739_s10 + $0x20] sm:$0xff] (%p33_p3) }
  0x13   : > { %305 = vst [vmem:[%s2744_s11 + $0x10] sm:$0xff] (%p33_p3), %v304_v2  ;;  %v310_v5 = vld [vmem:[%s2739_s10 + $0x28] sm:$0xff] (%p33_p3)  ;;  %307 = vst [vmem:[%s2744_s11 + $0x18] sm:$0xff] (%p33_p3), %v306_v3  ;;  %v312_v6 = vld [vmem:[%s2739_s10 + $0x30] sm:$0xff] (%p33_p3) }
  0x14   : > { %309 = vst [vmem:[%s2744_s11 + $0x20] sm:$0xff] (%p33_p3), %v308_v4  ;;  %311 = vst [vmem:[%s2744_s11 + $0x28] sm:$0xff] (%p33_p3), %v310_v5  ;;  %v314_v7 = vld [vmem:[%s2739_s10 + $0x38] sm:$0xff] (%p33_p3)  ;;  %v316_v8 = vld [vmem:[%s2739_s10 + $0x40] sm:$0xff] (%p33_p3) }
  0x15   : > { %313 = vst [vmem:[%s2744_s11 + $0x30] sm:$0xff] %v312_v6  ;;  %315 = vst [vmem:[%s2744_s11 + $0x38] sm:$0xff] %v314_v7  ;;  %v318_v9 = vld [vmem:[%s2739_s10 + $0x48] sm:$0xff]  ;;  %v320_v10 = vld [vmem:[%s2739_s10 + $0x50] sm:$0xff] }
  0x16   : > { %317 = vst [vmem:[%s2744_s11 + $0x40] sm:$0xff] %v316_v8  ;;  %v322_v11 = vld [vmem:[%s2739_s10 + $0x58] sm:$0xff]  ;;  %319 = vst [vmem:[%s2744_s11 + $0x48] sm:$0xff] %v318_v9  ;;  %v324_v12 = vld [vmem:[%s2739_s10 + $0x60] sm:$0xff] }
  0x17   : > { %321 = vst [vmem:[%s2744_s11 + $0x50] sm:$0xff] %v320_v10  ;;  %323 = vst [vmem:[%s2744_s11 + $0x58] sm:$0xff] %v322_v11  ;;  %v326_v13 = vld [vmem:[%s2739_s10 + $0x68] sm:$0xff]  ;;  %v328_v14 = vld [vmem:[%s2739_s10 + $0x70] sm:$0xff] }
  0x18   : > { %325 = vst [vmem:[%s2744_s11 + $0x60] sm:$0xff] %v324_v12  ;;  %327 = vst [vmem:[%s2744_s11 + $0x68] sm:$0xff] %v326_v13  ;;  %v330_v15 = vld [vmem:[%s2739_s10 + $0x78] sm:$0xff]  ;;  %v332_v16 = vld [vmem:[%s2739_s10 + $0x100] sm:$0xff] }
  0x19   : > { %329 = vst [vmem:[%s2744_s11 + $0x70] sm:$0xff] %v328_v14  ;;  %v334_v17 = vld [vmem:[%s2739_s10 + $0x108] sm:$0xff]  ;;  %331 = vst [vmem:[%s2744_s11 + $0x78] sm:$0xff] %v330_v15  ;;  %v336_v18 = vld [vmem:[%s2739_s10 + $0x110] sm:$0xff] }
  0x1a   : > { %333 = vst [vmem:[%s2744_s11 + $0x80] sm:$0xff] %v332_v16  ;;  %335 = vst [vmem:[%s2744_s11 + $0x88] sm:$0xff] %v334_v17  ;;  %v338_v19 = vld [vmem:[%s2739_s10 + $0x118] sm:$0xff]  ;;  %v340_v20 = vld [vmem:[%s2739_s10 + $0x120] sm:$0xff] }
  0x1b   : > { %337 = vst [vmem:[%s2744_s11 + $0x90] sm:$0xff] %v336_v18  ;;  %339 = vst [vmem:[%s2744_s11 + $0x98] sm:$0xff] %v338_v19  ;;  %v342_v21 = vld [vmem:[%s2739_s10 + $0x128] sm:$0xff]  ;;  %v344_v22 = vld [vmem:[%s2739_s10 + $0x130] sm:$0xff] }
  0x1c   : > { %341 = vst [vmem:[%s2744_s11 + $0xa0] sm:$0xff] %v340_v20  ;;  %v346_v23 = vld [vmem:[%s2739_s10 + $0x138] sm:$0xff]  ;;  %343 = vst [vmem:[%s2744_s11 + $0xa8] sm:$0xff] %v342_v21  ;;  %v348_v24 = vld [vmem:[%s2739_s10 + $0x140] sm:$0xff] }
  0x1d   : > { %345 = vst [vmem:[%s2744_s11 + $0xb0] sm:$0xff] %v344_v22  ;;  %347 = vst [vmem:[%s2744_s11 + $0xb8] sm:$0xff] %v346_v23  ;;  %v350_v25 = vld [vmem:[%s2739_s10 + $0x148] sm:$0xff]  ;;  %v352_v26 = vld [vmem:[%s2739_s10 + $0x150] sm:$0xff] }
  0x1e   : > { %349 = vst [vmem:[%s2744_s11 + $0xc0] sm:$0xff] %v348_v24  ;;  %351 = vst [vmem:[%s2744_s11 + $0xc8] sm:$0xff] %v350_v25  ;;  %v354_v27 = vld [vmem:[%s2739_s10 + $0x158] sm:$0xff]  ;;  %v356_v28 = vld [vmem:[%s2739_s10 + $0x160] sm:$0xff] }
  0x1f   : > { %353 = vst [vmem:[%s2744_s11 + $0xd0] sm:$0xff] %v352_v26  ;;  %v358_v29 = vld [vmem:[%s2739_s10 + $0x168] sm:$0xff]  ;;  %355 = vst [vmem:[%s2744_s11 + $0xd8] sm:$0xff] %v354_v27  ;;  %v360_v30 = vld [vmem:[%s2739_s10 + $0x170] sm:$0xff] }
  0x20   : > { %357 = vst [vmem:[%s2744_s11 + $0xe0] sm:$0xff] %v356_v28  ;;  %359 = vst [vmem:[%s2744_s11 + $0xe8] sm:$0xff] %v358_v29  ;;  %v362_v31 = vld [vmem:[%s2739_s10 + $0x178] sm:$0xff] }
  0x21   : > { %361 = vst [vmem:[%s2744_s11 + $0xf0] sm:$0xff] %v360_v30  ;;  %363 = vst [vmem:[%s2744_s11 + $0xf8] sm:$0xff] %v362_v31 }
  0x22 PF: > { %p2028_p5 = scmp.ge.s32.totalorder %s2661_s23, 1  ;;  %p378_p6 = scmp.lt.s32.totalorder %s2661_s23, 3 }
  0x24   : > { %p379_p7 = pnand %p2028_p5, %p378_p6 }
  0x26   : > { %382 = sbr.rel (%p379_p7) target bundleno = 977 (0x3d1), region = 78 }
  0x2d   : > { %s385_s12 = sand.u32 1, %s2653_s21   ;;  %s2030_s13 = sshll.u32 %s2719_s24, 4 }
  0x2e   : > { %s2029_s14 = sshll.u32 %s385_s12, 8  ;;  %p417_p8 = scmp.lt.s32.totalorder %s2030_s13, 31 }
  0x2f   : > { %s2816_s19 = scalar_lea.vmem [#allocation3], %s2029_s14  ;;  %p2033_p9 = scmp.ne.s32.totalorder %s2719_s24, 0 }
  0x30   : > { %s3495_s13 = smov (!%p417_p8, %s2030_s13), 31  ;;  %v2663_v32 = vmov (!%p2033_p9), 0.0  }
  0x31   : > { %s2137_s15 = sshll.u32 %s3495_s13, 3  ;;  %427 = sbr.rel (%p2033_p9) target bundleno = 56 (0x38), region = 86  ;;  %428 = vst [vmem:[#allocation4] sm:$0xff] (!%p2033_p9), %v2663_v32  ;;  %429 = vst [vmem:[#allocation4 + $0x8] sm:$0xff] (!%p2033_p9), %v2663_v32 }
  0x32   : > { %s2814_s18 = scalar_lea.vmem %s3434_s4, %s2137_s15  ;;  %430 = vst [vmem:[#allocation4 + $0x10] sm:$0xff] (!%p2033_p9), %v2663_v32  ;;  %431 = vst [vmem:[#allocation4 + $0x18] sm:$0xff] (!%p2033_p9), %v2663_v32 }
  0x33   : > { %432 = vst [vmem:[#allocation4 + $0x20] sm:$0xff] (!%p2033_p9), %v2663_v32  ;;  %433 = vst [vmem:[#allocation4 + $0x28] sm:$0xff] (!%p2033_p9), %v2663_v32 }
  0x34   : > { %434 = vst [vmem:[#allocation4 + $0x30] sm:$0xff] (!%p2033_p9), %v2663_v32  ;;  %435 = vst [vmem:[#allocation4 + $0x38] sm:$0xff] (!%p2033_p9), %v2663_v32 }
  0x38 PF: > { %v2050_v33 = vld [vmem:[%s2816_s19 + $0x80] sm:$0xff]  ;;  %v3437_v35 = vmov 0   ;;  %v2051_v36 = vld [vmem:[%s2816_s19 + $0x88] sm:$0xff]  ;;  %v439_v38 = vld [vmem:[%s2816_s19 + $0x18] sm:$0xff]  ;;  %v534_v12 = vlaneseq  ;;  %p2131_p10 = scmp.ne.s32.totalorder %s2719_s24, 1 }
  0x39   : > { %v436_v34 = vld [vmem:[%s2816_s19] sm:$0xff]  ;;  %2318 = vset.pattern.permute.xlu1 %v3437_v35  ;;  %2317 = vset.pattern.permute.xlu0 %v3437_v35  ;;  %v437_v37 = vld [vmem:[%s2816_s19 + $0x8] sm:$0xff]  ;;  %v438_v39 = vld [vmem:[%s2816_s19 + $0x10] sm:$0xff] }
  0x3a   : > { %1096 = vperm.xlu1 %2318, %v2050_v33   ;;  %455 = vperm.xlu0 %2317, %v436_v34   ;;  %v2053_v40 = vld [vmem:[%s2816_s19 + $0x98] sm:$0xff]  ;;  %v2052_v41 = vld [vmem:[%s2816_s19 + $0x90] sm:$0xff]  ;;  %v441_v42 = vld [vmem:[%s2816_s19 + $0x28] sm:$0xff]  ;;  %v535_v13 = vshrl.u32 %v534_v12, 7 }
  0x3b   : > { %v440_v43 = vld [vmem:[%s2816_s19 + $0x20] sm:$0xff]  ;;  %v2055_v44 = vld [vmem:[%s2816_s19 + $0xa8] sm:$0xff]  ;;  %v443_v46 = vld [vmem:[%s2816_s19 + $0x38] sm:$0xff] }
  0x3c   : > { %v2054_v45 = vld [vmem:[%s2816_s19 + $0xa0] sm:$0xff]  ;;  %v442_v47 = vld [vmem:[%s2816_s19 + $0x30] sm:$0xff]  ;;  %v2057_v48 = vld [vmem:[%s2816_s19 + $0xb8] sm:$0xff]  ;;  %v2883_v14 = vsub.s32 0, %v535_v13  ;;  %v2885_v15 = vsub.s32 1, %v535_v13 }
  0x3d   : > { %v2056_v49 = vld [vmem:[%s2816_s19 + $0xb0] sm:$0xff]  ;;  %v445_v50 = vld [vmem:[%s2816_s19 + $0x48] sm:$0xff]  ;;  %v444_v51 = vld [vmem:[%s2816_s19 + $0x40] sm:$0xff] }
  0x3e   : > { %1101 = vperm.xlu1 %2318, %v2051_v36   ;;  %460 = vperm.xlu0 %2317, %v437_v37   ;;  %v2059_v52 = vld [vmem:[%s2816_s19 + $0xc8] sm:$0xff]  ;;  %v2058_v53 = vld [vmem:[%s2816_s19 + $0xc0] sm:$0xff]  ;;  %v447_v54 = vld [vmem:[%s2816_s19 + $0x58] sm:$0xff]  ;;  %3456 = vst [vmem:[#allocation7_spill] sm:$0xff] %v2883_v14 }
  0x3f   : > { %v446_v55 = vld [vmem:[%s2816_s19 + $0x50] sm:$0xff]  ;;  %v2061_v56 = vld [vmem:[%s2816_s19 + $0xd8] sm:$0xff]  ;;  %v449_v58 = vld [vmem:[%s2816_s19 + $0x68] sm:$0xff]  ;;  %3457 = vst [vmem:[#allocation8_spill] sm:$0xff] %v2885_v15 }
  0x40   : > { %v2060_v57 = vld [vmem:[%s2816_s19 + $0xd0] sm:$0xff]  ;;  %v448_v59 = vld [vmem:[%s2816_s19 + $0x60] sm:$0xff]  ;;  %v2063_v60 = vld [vmem:[%s2816_s19 + $0xe8] sm:$0xff] }
  0x41   : > { %v2062_v61 = vld [vmem:[%s2816_s19 + $0xe0] sm:$0xff]  ;;  %v451_v62 = vld [vmem:[%s2816_s19 + $0x78] sm:$0xff]  ;;  %v450_v63 = vld [vmem:[%s2816_s19 + $0x70] sm:$0xff] }
  0x42   : > { %470 = vperm.xlu1 %2318, %v439_v38   ;;  %465 = vperm.xlu0 %2317, %v438_v39   ;;  %v2065_v0 = vld [vmem:[%s2816_s19 + $0xf8] sm:$0xff]  ;;  %v2064_v1 = vld [vmem:[%s2816_s19 + $0xf0] sm:$0xff]  ;;  %v2361_v2 = vld [vmem:[%s3432_s2 + $0x40] sm:$0xff]  }
  0x43   : > { %v2362_v3 = vld [vmem:[%s3432_s2] sm:$0xff]   ;;  %v2363_v4 = vld [vmem:[%s3432_s2 + $0x48] sm:$0xff]   ;;  %2138 = vmatprep.subr.bf16.mxu0 %v2361_v2  ;;  %v2367_v9 = vld [vmem:[%s3432_s2 + $0x50] sm:$0xff]  }
  0x44   : > { %v2364_v5 = vld [vmem:[%s3432_s2 + $0xc0] sm:$0xff]   ;;  %v2368_v7 = vld [vmem:[%s3432_s2 + $0xc8] sm:$0xff]   ;;  %2139 = vmatpush3.bf16.msra.mxu0 %v2362_v3  ;;  %v2369_v11 = vld [vmem:[%s3432_s2 + $0x10] sm:$0xff]  }
  0x45   : > { %v2366_v6 = vld [vmem:[%s3432_s2 + $0x80] sm:$0xff]   ;;  %2202 = vmatprep.subr.bf16.mxu1 %v2364_v5  ;;  %v2365_v8 = vld [vmem:[%s3432_s2 + $0x8] sm:$0xff]   ;;  %2140 = vmatprep.subr.bf16.mxu0 %v2363_v4  ;;  %v2373_v4 = vld [vmem:[%s3432_s2 + $0x18] sm:$0xff]  }
  0x46   : > { %1111 = vperm.xlu1 %2318, %v2053_v40   ;;  %1106 = vperm.xlu0 %2317, %v2052_v41   ;;  %v2370_v10 = vld [vmem:[%s3432_s2 + $0x88] sm:$0xff]   ;;  %v2066_v16 = vld [vmem:[%s3431_s1 + $0x2] sm:$0x3]  ;;  %v452_v17 = vld [vmem:[%s3431_s1] sm:$0x3] }
  0x47   : > { %2203 = vmatpush3.bf16.msra.mxu1 %v2366_v6  ;;  %v2894_v18 = vrot.slane %v2066_v16, %v2883_v14  ;;  %v2897_v19 = vrot.slane %v2066_v16, %v2885_v15  ;;  %v2900_v20 = vrot.slane %v452_v17, %v2883_v14  ;;  %v2903_v21 = vrot.slane %v452_v17, %v2885_v15  ;;  %v2374_v5 = vld [vmem:[%s3432_s2 + $0x90] sm:$0xff]   ;;  %v2375_v16 = vld [vmem:[%s3432_s2 + $0x60] sm:$0xff]   ;;  %v2376_v17 = vld [vmem:[%s3432_s2 + $0xd8] sm:$0xff]  }
  0x48   : > { %2204 = vmatprep.subr.bf16.mxu1 %v2368_v7  ;;  %2141 = vmatpush3.bf16.msra.mxu0 %v2365_v8 }
  0x49   : > { %2142 = vmatprep.subr.bf16.mxu0 %v2367_v9 }
  0x4a   : > { %480 = vperm.xlu1 %2318, %v441_v42   ;;  %475 = vperm.xlu0 %2317, %v440_v43  }
  0x4b   : > { %2205 = vmatpush3.bf16.msra.mxu1 %v2370_v10 }
  0x4c   : > { %2143 = vmatpush3.bf16.msra.mxu0 %v2369_v11 }
  0x4e   : > { %1121 = vperm.xlu1 %2318, %v2055_v44   ;;  %1116 = vperm.xlu0 %2317, %v2054_v45  }
  0x52   : > { %490 = vperm.xlu1 %2318, %v443_v46   ;;  %485 = vperm.xlu0 %2317, %v442_v47  }
  0x56   : > { %1131 = vperm.xlu1 %2318, %v2057_v48   ;;  %1126 = vperm.xlu0 %2317, %v2056_v49  }
  0x5a   : > { %500 = vperm.xlu1 %2318, %v445_v50   ;;  %495 = vperm.xlu0 %2317, %v444_v51  }
  0x5e   : > { %1141 = vperm.xlu1 %2318, %v2059_v52   ;;  %1136 = vperm.xlu0 %2317, %v2058_v53  }
  0x62   : > { %510 = vperm.xlu1 %2318, %v447_v54   ;;  %505 = vperm.xlu0 %2317, %v446_v55  }
  0x66   : > { %1151 = vperm.xlu1 %2318, %v2061_v56   ;;  %1146 = vperm.xlu0 %2317, %v2060_v57  }
  0x6a   : > { %520 = vperm.xlu1 %2318, %v449_v58   ;;  %515 = vperm.xlu0 %2317, %v448_v59  }
  0x6e   : > { %1161 = vperm.xlu1 %2318, %v2063_v60   ;;  %1156 = vperm.xlu0 %2317, %v2062_v61  }
  0x72   : > { %530 = vperm.xlu1 %2318, %v451_v62   ;;  %525 = vperm.xlu0 %2317, %v450_v63  }
  0x76   : > { %1171 = vperm.xlu1 %2318, %v2065_v0   ;;  %1166 = vperm.xlu0 %2317, %v2064_v1   ;;  %v2371_v0 = vld [vmem:[%s3432_s2 + $0x58] sm:$0xff]   ;;  %v2372_v1 = vld [vmem:[%s3432_s2 + $0xd0] sm:$0xff]  }
  0x77   : > { %2144 = vmatprep.subr.bf16.mxu0 %v2371_v0  ;;  %2206 = vmatprep.subr.bf16.mxu1 %v2372_v1  ;;  %v2383_v1 = vld [vmem:[%s3432_s2 + $0x70] sm:$0xff]  }
  0x78   : > { %2145 = vmatpush3.bf16.msra.mxu0 %v2373_v4  ;;  %2207 = vmatpush3.bf16.msra.mxu1 %v2374_v5  ;;  %v2384_v4 = vld [vmem:[%s3432_s2 + $0xe8] sm:$0xff]  }
  0x79   : > { %2146 = vmatprep.subr.bf16.mxu0 %v2375_v16  ;;  %2208 = vmatprep.subr.bf16.mxu1 %v2376_v17  ;;  %v2386_v16 = vld [vmem:[%s3432_s2 + $0xa8] sm:$0xff]  }
  0xb9   : > { %v1097_v22 = vpop.permute.xlu1 %1096  ;;  %v456_v23 = vpop.permute.xlu0 %455 }
  0xba   : > { %v2906_v24 = vmul.f32 %v2894_v18, %v1097_v22  ;;  %v2909_v25 = vmul.f32 %v2897_v19, %v1097_v22  ;;  %v2912_v26 = vmul.f32 %v2900_v20, %v456_v23  ;;  %v2915_v27 = vmul.f32 %v2903_v21, %v456_v23 }
  0xbc   : > { %v576_v28 = vmax.f32 %v2912_v26, %v2915_v27  ;;  %v1217_v33 = vmax.f32 %v2906_v24, %v2909_v25 }
  0xbd   : > { %v1102_v29 = vpop.permute.xlu1 %1101  ;;  %v461_v30 = vpop.permute.xlu0 %460 }
  0xbe   : > { %v2920_v31 = vmul.f32 %v2900_v20, %v461_v30  ;;  %v2923_v32 = vmul.f32 %v2903_v21, %v461_v30  ;;  %577 = vmax.xlane.f32.xlu0 %v576_v28  ;;  %v2928_v34 = vmul.f32 %v2894_v18, %v1102_v29  ;;  %v2931_v36 = vmul.f32 %v2897_v19, %v1102_v29  ;;  %v2377_v30 = vld [vmem:[%s3432_s2 + $0x20] sm:$0xff]  }
  0xbf   : > { %2147 = vmatpush3.bf16.msra.mxu0 %v2377_v30 }
  0xc0   : > { %v579_v37 = vmax.f32 %v2920_v31, %v2923_v32  ;;  %v1220_v44 = vmax.f32 %v2928_v34, %v2931_v36 }
  0xc1   : > { %v471_v38 = vpop.permute.xlu1 %470  ;;  %v466_v39 = vpop.permute.xlu0 %465 }
  0xc2   : > { %v2936_v40 = vmul.f32 %v2900_v20, %v466_v39  ;;  %v2939_v41 = vmul.f32 %v2903_v21, %v466_v39  ;;  %1218 = vmax.xlane.f32.xlu0 %v1217_v33  ;;  %580 = vmax.xlane.f32.xlu1 %v579_v37  ;;  %v2942_v42 = vmul.f32 %v2900_v20, %v471_v38  ;;  %v2378_v33 = vld [vmem:[%s3432_s2 + $0x98] sm:$0xff]  }
  0xc3   : > { %v2945_v43 = vmul.f32 %v2903_v21, %v471_v38  ;;  %2209 = vmatpush3.bf16.msra.mxu1 %v2378_v33  ;;  %v2387_v33 = vld [vmem:[%s3432_s2 + $0x78] sm:$0xff]  }
  0xc4   : > { %v582_v45 = vmax.f32 %v2936_v40, %v2939_v41 }
  0xc5   : > { %v1112_v46 = vpop.permute.xlu1 %1111  ;;  %v1107_v47 = vpop.permute.xlu0 %1106  ;;  %v585_v52 = vmax.f32 %v2942_v42, %v2945_v43 }
  0xc6   : > { %v2952_v48 = vmul.f32 %v2894_v18, %v1107_v47  ;;  %v2955_v49 = vmul.f32 %v2897_v19, %v1107_v47  ;;  %1221 = vmax.xlane.f32.xlu0 %v1220_v44  ;;  %583 = vmax.xlane.f32.xlu1 %v582_v45  ;;  %v2958_v50 = vmul.f32 %v2894_v18, %v1112_v46  ;;  %v2379_v45 = vld [vmem:[%s3432_s2 + $0x68] sm:$0xff]  }
  0xc7   : > { %v2961_v51 = vmul.f32 %v2897_v19, %v1112_v46  ;;  %v2380_v46 = vld [vmem:[%s3432_s2 + $0xe0] sm:$0xff]   ;;  %2148 = vmatprep.subr.bf16.mxu0 %v2379_v45 }
  0xc8   : > { %v1223_v53 = vmax.f32 %v2952_v48, %v2955_v49  ;;  %2210 = vmatprep.subr.bf16.mxu1 %v2380_v46 }
  0xc9   : > { %v481_v54 = vpop.permute.xlu1 %480  ;;  %v476_v55 = vpop.permute.xlu0 %475  ;;  %v1226_v60 = vmax.f32 %v2958_v50, %v2961_v51 }
  0xca   : > { %v2968_v56 = vmul.f32 %v2900_v20, %v476_v55  ;;  %v2971_v57 = vmul.f32 %v2903_v21, %v476_v55  ;;  %586 = vmax.xlane.f32.xlu0 %v585_v52  ;;  %v2974_v58 = vmul.f32 %v2900_v20, %v481_v54  ;;  %v2977_v59 = vmul.f32 %v2903_v21, %v481_v54  ;;  %v2381_v55 = vld [vmem:[%s3432_s2 + $0x28] sm:$0xff]  }
  0xcb   : > { %1224 = vmax.xlane.f32.xlu1 %v1223_v53  ;;  %2149 = vmatpush3.bf16.msra.mxu0 %v2381_v55  ;;  %v2390_v55 = vld [vmem:[%s3432_s2 + $0xb0] sm:$0xff]  }
  0xcc   : > { %v588_v61 = vmax.f32 %v2968_v56, %v2971_v57  ;;  %v591_v6 = vmax.f32 %v2974_v58, %v2977_v59  ;;  %2150 = vmatprep.subr.bf16.mxu0 %v2383_v1 }
  0xcd   : > { %v1122_v62 = vpop.permute.xlu1 %1121  ;;  %v1117_v63 = vpop.permute.xlu0 %1116 }
  0xce   : > { %v2990_v2 = vmul.f32 %v2894_v18, %v1117_v63  ;;  %v2993_v3 = vmul.f32 %v2897_v19, %v1117_v63  ;;  %1227 = vmax.xlane.f32.xlu0 %v1226_v60  ;;  %v3004_v7 = vmul.f32 %v2894_v18, %v1122_v62  ;;  %v3007_v8 = vmul.f32 %v2897_v19, %v1122_v62  ;;  %v2382_v60 = vld [vmem:[%s3432_s2 + $0xa0] sm:$0xff]  }
  0xcf   : > { %589 = vmax.xlane.f32.xlu1 %v588_v61  ;;  %2211 = vmatpush3.bf16.msra.mxu1 %v2382_v60 }
  0xd0   : > { %v1229_v9 = vmax.f32 %v2990_v2, %v2993_v3  ;;  %v1232_v28 = vmax.f32 %v3004_v7, %v3007_v8  ;;  %2212 = vmatprep.subr.bf16.mxu1 %v2384_v4 }
  0xd1   : > { %v491_v10 = vpop.permute.xlu1 %490  ;;  %v486_v11 = vpop.permute.xlu0 %485 }
  0xd2   : > { %v3012_v12 = vmul.f32 %v2900_v20, %v486_v11  ;;  %v3015_v13 = vmul.f32 %v2903_v21, %v486_v11  ;;  %592 = vmax.xlane.f32.xlu0 %v591_v6  ;;  %v3024_v22 = vmul.f32 %v2900_v20, %v491_v10  ;;  %v3027_v23 = vmul.f32 %v2903_v21, %v491_v10  ;;  %v2385_v11 = vld [vmem:[%s3432_s2 + $0x30] sm:$0xff]  }
  0xd3   : > { %1230 = vmax.xlane.f32.xlu1 %v1229_v9  ;;  %2151 = vmatpush3.bf16.msra.mxu0 %v2385_v11 }
  0xd4   : > { %v594_v29 = vmax.f32 %v3012_v12, %v3015_v13  ;;  %v597_v53 = vmax.f32 %v3024_v22, %v3027_v23  ;;  %2213 = vmatpush3.bf16.msra.mxu1 %v2386_v16  ;;  %2152 = vmatprep.subr.bf16.mxu0 %v2387_v33  ;;  %v2391_v16 = vld [vmem:[%s3432_s2 + $0xf8] sm:$0xff]  }
  0xd5   : > { %v1132_v37 = vpop.permute.xlu1 %1131  ;;  %v1127_v38 = vpop.permute.xlu0 %1126  ;;  %v2392_v33 = vld [vmem:[%s3432_s2 + $0xb8] sm:$0xff]  }
  0xd6   : > { %v3040_v39 = vmul.f32 %v2894_v18, %v1127_v38  ;;  %v3043_v44 = vmul.f32 %v2897_v19, %v1127_v38  ;;  %1233 = vmax.xlane.f32.xlu0 %v1232_v28  ;;  %v3052_v47 = vmul.f32 %v2894_v18, %v1132_v37  ;;  %v3055_v52 = vmul.f32 %v2897_v19, %v1132_v37  ;;  %v2388_v37 = vld [vmem:[%s3432_s2 + $0xf0] sm:$0xff]  }
  0xd7   : > { %595 = vmax.xlane.f32.xlu1 %v594_v29  ;;  %2214 = vmatprep.subr.bf16.mxu1 %v2388_v37 }
  0xd8   : > { %v1235_v54 = vmax.f32 %v3040_v39, %v3043_v44  ;;  %v1238_v9 = vmax.f32 %v3052_v47, %v3055_v52  ;;  %2215 = vmatpush3.bf16.msra.mxu1 %v2390_v55 }
  0xd9   : > { %v501_v61 = vpop.permute.xlu1 %500  ;;  %v496_v62 = vpop.permute.xlu0 %495  ;;  %2216 = vmatprep.subr.bf16.mxu1 %v2391_v16 }
  0xda   : > { %v3068_v63 = vmul.f32 %v2900_v20, %v496_v62  ;;  %v3071_v0 = vmul.f32 %v2903_v21, %v496_v62  ;;  %598 = vmax.xlane.f32.xlu0 %v597_v53  ;;  %v3080_v5 = vmul.f32 %v2900_v20, %v501_v61  ;;  %v3083_v6 = vmul.f32 %v2903_v21, %v501_v61 }
  0xdb   : > { %1236 = vmax.xlane.f32.xlu1 %v1235_v54  ;;  %v2389_v54 = vld [vmem:[%s3432_s2 + $0x38] sm:$0xff]  }
  0xdc   : > { %v600_v10 = vmax.f32 %v3068_v63, %v3071_v0  ;;  %v603_v46 = vmax.f32 %v3080_v5, %v3083_v6  ;;  %2153 = vmatpush3.bf16.msra.mxu0 %v2389_v54  ;;  %2217 = vmatpush3.bf16.msra.mxu1 %v2392_v33 }
  0xdd   : > { %v1142_v17 = vpop.permute.xlu1 %1141  ;;  %v1137_v28 = vpop.permute.xlu0 %1136 }
  0xde   : > { %v3096_v29 = vmul.f32 %v2894_v18, %v1137_v28  ;;  %v3099_v30 = vmul.f32 %v2897_v19, %v1137_v28  ;;  %1239 = vmax.xlane.f32.xlu0 %v1238_v9  ;;  %v3108_v38 = vmul.f32 %v2894_v18, %v1142_v17  ;;  %v3111_v45 = vmul.f32 %v2897_v19, %v1142_v17 }
  0xdf   : > { %601 = vmax.xlane.f32.xlu1 %v600_v10 }
  0xe0   : > { %v1241_v53 = vmax.f32 %v3096_v29, %v3099_v30  ;;  %v1244_v10 = vmax.f32 %v3108_v38, %v3111_v45 }
  0xe1   : > { %v511_v60 = vpop.permute.xlu1 %510  ;;  %v506_v61 = vpop.permute.xlu0 %505 }
  0xe2   : > { %v3124_v62 = vmul.f32 %v2900_v20, %v506_v61  ;;  %v3127_v1 = vmul.f32 %v2903_v21, %v506_v61  ;;  %604 = vmax.xlane.f32.xlu0 %v603_v46  ;;  %v3130_v4 = vmul.f32 %v2900_v20, %v511_v60  ;;  %v3133_v9 = vmul.f32 %v2903_v21, %v511_v60 }
  0xe3   : > { %1242 = vmax.xlane.f32.xlu1 %v1241_v53 }
  0xe4   : > { %v606_v11 = vmax.f32 %v3124_v62, %v3127_v1  ;;  %v609_v55 = vmax.f32 %v3130_v4, %v3133_v9 }
  0xe5   : > { %v1152_v17 = vpop.permute.xlu1 %1151  ;;  %v1147_v28 = vpop.permute.xlu0 %1146 }
  0xe6   : > { %v3146_v37 = vmul.f32 %v2894_v18, %v1147_v28  ;;  %v3149_v46 = vmul.f32 %v2897_v19, %v1147_v28  ;;  %1245 = vmax.xlane.f32.xlu0 %v1244_v10  ;;  %v3152_v53 = vmul.f32 %v2894_v18, %v1152_v17  ;;  %v3155_v54 = vmul.f32 %v2897_v19, %v1152_v17 }
  0xe7   : > { %607 = vmax.xlane.f32.xlu1 %v606_v11 }
  0xe8   : > { %3458 = vst [vmem:[#allocation9_spill] sm:$0xff] %v3149_v46  ;;  %3459 = vst [vmem:[#allocation10_spill] sm:$0xff] %v3152_v53  ;;  %v1247_v60 = vmax.f32 %v3146_v37, %v3149_v46  ;;  %v1250_v17 = vmax.f32 %v3152_v53, %v3155_v54 }
  0xe9   : > { %3460 = vst [vmem:[#allocation11_spill] sm:$0xff] %v3155_v54  ;;  %v521_v61 = vpop.permute.xlu1 %520  ;;  %v516_v35 = vpop.permute.xlu0 %515 }
  0xea   : > { %v3162_v28 = vmul.f32 %v2900_v20, %v516_v35  ;;  %v3165_v10 = vmul.f32 %v2903_v21, %v516_v35  ;;  %610 = vmax.xlane.f32.xlu0 %v609_v55  ;;  %v3168_v11 = vmul.f32 %v2900_v20, %v521_v61  ;;  %v3171_v16 = vmul.f32 %v2903_v21, %v521_v61 }
  0xeb   : > { %1248 = vmax.xlane.f32.xlu1 %v1247_v60 }
  0xec   : > { %3461 = vst [vmem:[#allocation12_spill] sm:$0xff] %v3162_v28  ;;  %3462 = vst [vmem:[#allocation13_spill] sm:$0xff] %v3165_v10  ;;  %v612_v33 = vmax.f32 %v3162_v28, %v3165_v10  ;;  %v615_v61 = vmax.f32 %v3168_v11, %v3171_v16 }
  0xed   : > { %3463 = vst [vmem:[#allocation14_spill] sm:$0xff] %v3168_v11  ;;  %3464 = vst [vmem:[#allocation15_spill] sm:$0xff] %v3171_v16  ;;  %v1162_v15 = vpop.permute.xlu1 %1161  ;;  %v1157_v14 = vpop.permute.xlu0 %1156 }
  0xee   : > { %v3178_v46 = vmul.f32 %v2894_v18, %v1157_v14  ;;  %v3181_v35 = vmul.f32 %v2897_v19, %v1157_v14  ;;  %1251 = vmax.xlane.f32.xlu0 %v1250_v17  ;;  %v3184_v55 = vmul.f32 %v2894_v18, %v1162_v15  ;;  %v3187_v60 = vmul.f32 %v2897_v19, %v1162_v15 }
  0xef   : > { %613 = vmax.xlane.f32.xlu1 %v612_v33 }
  0xf0   : > { %3465 = vst [vmem:[#allocation16_spill] sm:$0xff] %v3178_v46  ;;  %3466 = vst [vmem:[#allocation17_spill] sm:$0xff] %v3181_v35  ;;  %v1253_v10 = vmax.f32 %v3178_v46, %v3181_v35  ;;  %v1256_v33 = vmax.f32 %v3184_v55, %v3187_v60 }
  0xf1   : > { %v531_v28 = vpop.permute.xlu1 %530  ;;  %v526_v54 = vpop.permute.xlu0 %525 }
  0xf2   : > { %v3194_v53 = vmul.f32 %v2900_v20, %v526_v54  ;;  %v3197_v14 = vmul.f32 %v2903_v21, %v526_v54  ;;  %616 = vmax.xlane.f32.xlu0 %v615_v61  ;;  %v3200_v17 = vmul.f32 %v2900_v20, %v531_v28  ;;  %v3203_v15 = vmul.f32 %v2903_v21, %v531_v28 }
  0xf3   : > { %1254 = vmax.xlane.f32.xlu1 %v1253_v10 }
  0xf4   : > { %3467 = vst [vmem:[#allocation18_spill] sm:$0xff] %v3197_v14  ;;  %3468 = vst [vmem:[#allocation19_spill] sm:$0xff] %v3203_v15  ;;  %v618_v35 = vmax.f32 %v3194_v53, %v3197_v14  ;;  %v621_v28 = vmax.f32 %v3200_v17, %v3203_v15 }
  0xf5   : > { %v1172_v46 = vpop.permute.xlu1 %1171  ;;  %v1167_v16 = vpop.permute.xlu0 %1166 }
  0xf6   : > { %v3210_v11 = vmul.f32 %v2894_v18, %v1167_v16  ;;  %v3213_v54 = vmul.f32 %v2897_v19, %v1167_v16  ;;  %1257 = vmax.xlane.f32.xlu0 %v1256_v33  ;;  %v3216_v20 = vmul.f32 %v2894_v18, %v1172_v46  ;;  %v3219_v21 = vmul.f32 %v2897_v19, %v1172_v46 }
  0xf7   : > { %619 = vmax.xlane.f32.xlu1 %v618_v35 }
  0xf8   : > { %3469 = vst [vmem:[#allocation20_spill] sm:$0xff] %v3210_v11  ;;  %3470 = vst [vmem:[#allocation21_spill] sm:$0xff] %v3213_v54  ;;  %v1259_v10 = vmax.f32 %v3210_v11, %v3213_v54  ;;  %v1262_v16 = vmax.f32 %v3216_v20, %v3219_v21 }
  0xf9   : > { %3471 = vst [vmem:[#allocation22_spill] sm:$0xff] %v3216_v20  ;;  %3472 = vst [vmem:[#allocation23_spill] sm:$0xff] %v3219_v21 }
  0xfa   : > { %622 = vmax.xlane.f32.xlu0 %v621_v28 }
  0xfb   : > { %1260 = vmax.xlane.f32.xlu1 %v1259_v10 }
  0xfe   : > { %1263 = vmax.xlane.f32.xlu0 %v1262_v16 }
 0x14b   : > { %v578_v61 = vpop.xlane.xlu0 %577 }
 0x14c   : > { %v624_v35 = vsub.f32 %v2912_v26, %v578_v61  ;;  %v625_v18 = vsub.f32 %v2915_v27, %v578_v61 }
 0x14e   : > { %v656_v33 = vmul.f32 1.442695, %v624_v35  ;;  %v658_v19 = vmul.f32 1.442695, %v625_v18 }
 0x14f   : > { %v1219_v46 = vpop.xlane.xlu0 %1218  ;;  %v581_v14 = vpop.xlane.xlu1 %580 }
 0x150   : > { %2417 = vpow2.f32 %v656_v33  ;;  %v1265_v15 = vsub.f32 %v2906_v24, %v1219_v46  ;;  %v1266_v54 = vsub.f32 %v2909_v25, %v1219_v46  ;;  %v626_v28 = vsub.f32 %v2920_v31, %v581_v14 }
 0x151   : > { %2419 = vpow2.f32 %v658_v19  ;;  %v627_v10 = vsub.f32 %v2923_v32, %v581_v14 }
 0x152   : > { %v1297_v16 = vmul.f32 1.442695, %v1265_v15  ;;  %v660_v21 = vmul.f32 1.442695, %v626_v28  ;;  %v1299_v26 = vmul.f32 1.442695, %v1266_v54 }
 0x153   : > { %v662_v20 = vmul.f32 1.442695, %v627_v10  ;;  %v1222_v11 = vpop.xlane.xlu0 %1221  ;;  %v584_v27 = vpop.xlane.xlu1 %583 }
 0x154   : > { %2421 = vpow2.f32 %v1297_v16  ;;  %v1267_v61 = vsub.f32 %v2928_v34, %v1222_v11  ;;  %v1268_v35 = vsub.f32 %v2931_v36, %v1222_v11  ;;  %v628_v24 = vsub.f32 %v2936_v40, %v584_v27 }
 0x155   : > { %2423 = vpow2.f32 %v660_v21  ;;  %v629_v25 = vsub.f32 %v2939_v41, %v584_v27 }
 0x156   : > { %2425 = vpow2.f32 %v662_v20  ;;  %v1301_v31 = vmul.f32 1.442695, %v1267_v61  ;;  %v664_v32 = vmul.f32 1.442695, %v628_v24  ;;  %v1303_v15 = vmul.f32 1.442695, %v1268_v35 }
 0x157   : > { %2427 = vpow2.f32 %v1299_v26  ;;  %v666_v14 = vmul.f32 1.442695, %v629_v25  ;;  %v587_v18 = vpop.xlane.xlu0 %586 }
 0x158   : > { %2429 = vpow2.f32 %v1301_v31  ;;  %v1225_v54 = vpop.xlane.xlu1 %1224  ;;  %v630_v33 = vsub.f32 %v2942_v42, %v587_v18  ;;  %v631_v34 = vsub.f32 %v2945_v43, %v587_v18 }
 0x159   : > { %2431 = vpow2.f32 %v664_v32  ;;  %v1269_v36 = vsub.f32 %v2952_v48, %v1225_v54  ;;  %v1270_v40 = vsub.f32 %v2955_v49, %v1225_v54 }
 0x15a   : > { %v2418_v11 = vpop.eup %2417  ;;  %2433 = vpow2.f32 %v666_v14  ;;  %v668_v41 = vmul.f32 1.442695, %v630_v33  ;;  %v670_v46 = vmul.f32 1.442695, %v631_v34 }
 0x15b   : > { %v2420_v20 = vpop.eup %2419  ;;  %2435 = vpow2.f32 %v1303_v15  ;;  %v1305_v21 = vmul.f32 1.442695, %v1269_v36  ;;  %v1307_v19 = vmul.f32 1.442695, %v1270_v40  ;;  %v1228_v28 = vpop.xlane.xlu0 %1227 }
 0x15c   : > { %2437 = vpow2.f32 %v668_v41  ;;  %v590_v10 = vpop.xlane.xlu1 %589  ;;  %v1271_v42 = vsub.f32 %v2958_v50, %v1228_v28  ;;  %v1272_v43 = vsub.f32 %v2961_v51, %v1228_v28  ;;  %v720_v16 = vadd.f32 %v2420_v20, %v2418_v11 }
 0x15d   : > { %2439 = vpow2.f32 %v1305_v21  ;;  %v632_v48 = vsub.f32 %v2968_v56, %v590_v10  ;;  %v633_v49 = vsub.f32 %v2971_v57, %v590_v10 }
 0x15e   : > { %v3245_v26 = vpop.eup %2421  ;;  %2441 = vpow2.f32 %v1307_v19  ;;  %v1309_v27 = vmul.f32 1.442695, %v1271_v42  ;;  %721 = vadd.xlane.f32.xlu1 %v720_v16  ;;  %v1311_v25 = vmul.f32 1.442695, %v1272_v43 }
 0x15f   : > { %v2424_v61 = vpop.eup %2423  ;;  %2443 = vpow2.f32 %v670_v46  ;;  %v672_v35 = vmul.f32 1.442695, %v632_v48  ;;  %v674_v24 = vmul.f32 1.442695, %v633_v49  ;;  %v593_v31 = vpop.xlane.xlu0 %592 }
 0x160   : > { %v2426_v50 = vpop.eup %2425  ;;  %2445 = vpow2.f32 %v1309_v27  ;;  %v1231_v51 = vpop.xlane.xlu1 %1230  ;;  %v634_v32 = vsub.f32 %v2974_v58, %v593_v31  ;;  %v635_v56 = vsub.f32 %v2977_v59, %v593_v31  ;;  %v784_v14 = vpack.c.bf16 %v2424_v61, %v2418_v11 }
 0x161   : > { %v2428_v57 = vpop.eup %2427  ;;  %2447 = vpow2.f32 %v672_v35  ;;  %v1273_v15 = vsub.f32 %v2990_v2, %v1231_v51  ;;  %v1274_v18 = vsub.f32 %v2993_v3, %v1231_v51  ;;  %v785_v54 = vpack.c.bf16 %v2426_v50, %v2420_v20 }
 0x162   : > { %v2430_v33 = vpop.eup %2429  ;;  %2449 = vpow2.f32 %v674_v24  ;;  %v676_v34 = vmul.f32 1.442695, %v634_v32  ;;  %v678_v36 = vmul.f32 1.442695, %v635_v56  ;;  %v723_v40 = vadd.f32 %v2426_v50, %v2424_v61 }
 0x163   : > { %v3251_v41 = vpop.eup %2431  ;;  %2451 = vpow2.f32 %v1311_v25  ;;  %v1313_v21 = vmul.f32 1.442695, %v1273_v15  ;;  %v1315_v58 = vmul.f32 1.442695, %v1274_v18  ;;  %960 = vmatprep.mubr.bf16.mxu0 %v785_v54  ;;  %v1361_v59 = vadd.f32 %v2428_v57, %v3245_v26  ;;  %v1234_v11 = vpop.xlane.xlu0 %1233 }
 0x164   : > { %v2434_v19 = vpop.eup %2433  ;;  %2453 = vpow2.f32 %v676_v34  ;;  %724 = vadd.xlane.f32.xlu1 %v723_v40  ;;  %961 = vmatmul.mubr.bf16.vlgmr.msra.gmra.mrb[0].mxu0 %v784_v14  ;;  %v596_v2 = vpop.xlane.xlu1 %595  ;;  %v1275_v3 = vsub.f32 %v3004_v7, %v1234_v11  ;;  %v1276_v20 = vsub.f32 %v3007_v8, %v1234_v11  ;;  %v1425_v46 = vpack.c.bf16 %v2430_v33, %v3245_v26 }
 0x165   : > { %v2436_v28 = vpop.eup %2435  ;;  %2455 = vpow2.f32 %v1313_v21  ;;  %1362 = vadd.xlane.f32.xlu0 %v1361_v59  ;;  %v636_v10 = vsub.f32 %v3012_v12, %v596_v2  ;;  %v637_v42 = vsub.f32 %v3015_v13, %v596_v2  ;;  %v726_v43 = vadd.f32 %v2434_v19, %v3251_v41 }
 0x166   : > { %v2438_v16 = vpop.eup %2437  ;;  %2457 = vpow2.f32 %v1315_v58  ;;  %v1317_v48 = vmul.f32 1.442695, %v1275_v3  ;;  %v1319_v49 = vmul.f32 1.442695, %v1276_v20  ;;  %v1426_v27 = vpack.c.bf16 %v2436_v28, %v2428_v57 }
 0x167   : > { %v3260_v61 = vpop.eup %2439  ;;  %2459 = vpow2.f32 %v678_v36  ;;  %v680_v7 = vmul.f32 1.442695, %v636_v10  ;;  %v682_v8 = vmul.f32 1.442695, %v637_v42  ;;  %v1364_v26 = vadd.f32 %v2436_v28, %v2430_v33  ;;  %v599_v35 = vpop.xlane.xlu0 %598 }
 0x168   : > { %v2442_v24 = vpop.eup %2441  ;;  %2461 = vpow2.f32 %v1317_v48  ;;  %727 = vadd.xlane.f32.xlu1 %v726_v43  ;;  %1602 = vmatprep.mubr.bf16.mxu1 %v1426_v27  ;;  %v1237_v12 = vpop.xlane.xlu1 %1236  ;;  %v638_v13 = vsub.f32 %v3024_v22, %v599_v35  ;;  %v639_v25 = vsub.f32 %v3027_v23, %v599_v35  ;;  %v786_v31 = vpack.c.bf16 %v2438_v16, %v3251_v41 }
 0x169   : > { %v2444_v50 = vpop.eup %2443  ;;  %2463 = vpow2.f32 %v680_v7  ;;  %1365 = vadd.xlane.f32.xlu0 %v1364_v26  ;;  %1603 = vmatmul.mubr.bf16.vlgmr.msra.gmra.mrb[0].mxu1 %v1425_v46  ;;  %v1277_v51 = vsub.f32 %v3040_v39, %v1237_v12  ;;  %v1278_v32 = vsub.f32 %v3043_v44, %v1237_v12  ;;  %v1367_v56 = vadd.f32 %v2442_v24, %v3260_v61 }
 0x16a   : > { %v2446_v14 = vpop.eup %2445  ;;  %2465 = vpow2.f32 %v682_v8  ;;  %v684_v57 = vmul.f32 1.442695, %v638_v13  ;;  %v686_v15 = vmul.f32 1.442695, %v639_v25  ;;  %v787_v18 = vpack.c.bf16 %v2444_v50, %v2434_v19 }
 0x16b   : > { %v3268_v22 = vpop.eup %2447  ;;  %2467 = vpow2.f32 %v1319_v49  ;;  %v1321_v23 = vmul.f32 1.442695, %v1277_v51  ;;  %v1323_v54 = vmul.f32 1.442695, %v1278_v32  ;;  %v729_v33 = vadd.f32 %v2444_v50, %v2438_v16  ;;  %v1240_v34 = vpop.xlane.xlu0 %1239 }
 0x16c   : > { %v2450_v36 = vpop.eup %2449  ;;  %2469 = vpow2.f32 %v684_v57  ;;  %968 = vmatprep.mubr.bf16.mxu0 %v787_v18  ;;  %v602_v39 = vpop.xlane.xlu1 %601  ;;  %v1279_v44 = vsub.f32 %v3052_v47, %v1240_v34  ;;  %v1280_v40 = vsub.f32 %v3055_v52, %v1240_v34  ;;  %v1427_v41 = vpack.c.bf16 %v2446_v14, %v3260_v61 }
 0x16d   : > { %v2452_v21 = vpop.eup %2451  ;;  %2471 = vpow2.f32 %v1321_v23  ;;  %1368 = vadd.xlane.f32.xlu0 %v1367_v56  ;;  %730 = vadd.xlane.f32.xlu1 %v729_v33  ;;  %v640_v58 = vsub.f32 %v3068_v63, %v602_v39  ;;  %v641_v59 = vsub.f32 %v3071_v0, %v602_v39  ;;  %v732_v11 = vadd.f32 %v2450_v36, %v3268_v22 }
 0x16e   : > { %v2454_v19 = vpop.eup %2453  ;;  %2473 = vpow2.f32 %v1323_v54  ;;  %969 = vmatmul.mubr.bf16.gmra.mrb[4].mxu0 %v786_v31  ;;  %v1325_v2 = vmul.f32 1.442695, %v1279_v44  ;;  %v1327_v3 = vmul.f32 1.442695, %v1280_v40  ;;  %v1428_v47 = vpack.c.bf16 %v2452_v21, %v2442_v24 }
 0x16f   : > { %v3276_v20 = vpop.eup %2455  ;;  %2475 = vpow2.f32 %v686_v15  ;;  %v688_v52 = vmul.f32 1.442695, %v640_v58  ;;  %v690_v46 = vmul.f32 1.442695, %v641_v59  ;;  %v1370_v28 = vadd.f32 %v2452_v21, %v2446_v14  ;;  %v605_v10 = vpop.xlane.xlu0 %604 }
 0x170   : > { %v2458_v42 = vpop.eup %2457  ;;  %2477 = vpow2.f32 %v1325_v2  ;;  %1610 = vmatprep.mubr.bf16.mxu1 %v1428_v47  ;;  %v1243_v63 = vpop.xlane.xlu1 %1242  ;;  %v642_v0 = vsub.f32 %v3080_v5, %v605_v10  ;;  %v643_v43 = vsub.f32 %v3083_v6, %v605_v10  ;;  %v788_v16 = vpack.c.bf16 %v2454_v19, %v3268_v22  ;;  %v3475_v10 = vld [vmem:[#allocation11_spill] sm:$0xff] }
 0x171   : > { %v2460_v48 = vpop.eup %2459  ;;  %2479 = vpow2.f32 %v688_v52  ;;  %733 = vadd.xlane.f32.xlu1 %v732_v11  ;;  %1371 = vadd.xlane.f32.xlu0 %v1370_v28  ;;  %v1281_v49 = vsub.f32 %v3096_v29, %v1243_v63  ;;  %v1282_v27 = vsub.f32 %v3099_v30, %v1243_v63  ;;  %v1373_v61 = vadd.f32 %v2458_v42, %v3276_v20 }
 0x172   : > { %v2462_v7 = vpop.eup %2461  ;;  %2481 = vpow2.f32 %v690_v46  ;;  %1611 = vmatmul.mubr.bf16.gmra.mrb[4].mxu1 %v1427_v41  ;;  %v692_v8 = vmul.f32 1.442695, %v642_v0  ;;  %v694_v26 = vmul.f32 1.442695, %v643_v43  ;;  %v789_v5 = vpack.c.bf16 %v2460_v48, %v2450_v36  ;;  %v3473_v41 = vld [vmem:[#allocation9_spill] sm:$0xff]  ;;  %v3474_v46 = vld [vmem:[#allocation10_spill] sm:$0xff] }
 0x173   : > { %v3284_v35 = vpop.eup %2463  ;;  %2483 = vpow2.f32 %v1327_v3  ;;  %v1329_v6 = vmul.f32 1.442695, %v1281_v49  ;;  %v1331_v24 = vmul.f32 1.442695, %v1282_v27  ;;  %v735_v12 = vadd.f32 %v2460_v48, %v2454_v19  ;;  %v1246_v13 = vpop.xlane.xlu0 %1245  ;;  %v3476_v43 = vld [vmem:[#allocation12_spill] sm:$0xff]  ;;  %v3477_v48 = vld [vmem:[#allocation13_spill] sm:$0xff] }
 0x174   : > { %v2466_v25 = vpop.eup %2465  ;;  %2485 = vpow2.f32 %v692_v8  ;;  %976 = vmatprep.mubr.bf16.mxu0 %v789_v5  ;;  %v608_v29 = vpop.xlane.xlu1 %607  ;;  %v1283_v30 = vsub.f32 %v3108_v38, %v1246_v13  ;;  %v1284_v31 = vsub.f32 %v3111_v45, %v1246_v13  ;;  %v1429_v50 = vpack.c.bf16 %v2462_v7, %v3276_v20 }
 0x175   : > { %v2468_v51 = vpop.eup %2467  ;;  %2487 = vpow2.f32 %v1329_v6  ;;  %1374 = vadd.xlane.f32.xlu0 %v1373_v61  ;;  %736 = vadd.xlane.f32.xlu1 %v735_v12  ;;  %v644_v32 = vsub.f32 %v3124_v62, %v608_v29  ;;  %v645_v56 = vsub.f32 %v3127_v1, %v608_v29  ;;  %v738_v14 = vadd.f32 %v2466_v25, %v3284_v35  ;;  %v3478_v29 = vld [vmem:[#allocation14_spill] sm:$0xff] }
 0x176   : > { %v2470_v57 = vpop.eup %2469  ;;  %2489 = vpow2.f32 %v1331_v24  ;;  %977 = vmatmul.mubr.bf16.gmra.mrb[8].mxu0 %v788_v16  ;;  %v1333_v15 = vmul.f32 1.442695, %v1283_v30  ;;  %v1335_v18 = vmul.f32 1.442695, %v1284_v31  ;;  %v1430_v38 = vpack.c.bf16 %v2468_v51, %v2458_v42  ;;  %v3479_v31 = vld [vmem:[#allocation15_spill] sm:$0xff] }
 0x177   : > { %v3292_v22 = vpop.eup %2471  ;;  %2491 = vpow2.f32 %v694_v26  ;;  %v696_v45 = vmul.f32 1.442695, %v644_v32  ;;  %v698_v23 = vmul.f32 1.442695, %v645_v56  ;;  %v1376_v54 = vadd.f32 %v2468_v51, %v2462_v7  ;;  %v611_v33 = vpop.xlane.xlu0 %610  ;;  %v3480_v56 = vld [vmem:[#allocation16_spill] sm:$0xff] }
 0x178   : > { %v2474_v34 = vpop.eup %2473  ;;  %2493 = vpow2.f32 %v1333_v15  ;;  %1618 = vmatprep.mubr.bf16.mxu1 %v1430_v38  ;;  %v1249_v62 = vpop.xlane.xlu1 %1248  ;;  %v646_v1 = vsub.f32 %v3130_v4, %v611_v33  ;;  %v647_v36 = vsub.f32 %v3133_v9, %v611_v33  ;;  %v790_v39 = vpack.c.bf16 %v2470_v57, %v3284_v35 }
 0x179   : > { %v2476_v44 = vpop.eup %2475  ;;  %2495 = vpow2.f32 %v696_v45  ;;  %739 = vadd.xlane.f32.xlu1 %v738_v14  ;;  %1377 = vadd.xlane.f32.xlu0 %v1376_v54  ;;  %v1285_v40 = vsub.f32 %v3146_v37, %v1249_v62  ;;  %v1286_v21 = vsub.f32 %v3473_v41, %v1249_v62  ;;  %v1379_v58 = vadd.f32 %v2474_v34, %v3292_v22 }
 0x17a   : > { %v2478_v59 = vpop.eup %2477  ;;  %2497 = vpow2.f32 %v698_v23  ;;  %1619 = vmatmul.mubr.bf16.gmra.mrb[8].mxu1 %v1429_v50  ;;  %v700_v11 = vmul.f32 1.442695, %v646_v1  ;;  %v702_v19 = vmul.f32 1.442695, %v647_v36  ;;  %v791_v4 = vpack.c.bf16 %v2476_v44, %v2466_v25 }
 0x17b   : > { %v3300_v2 = vpop.eup %2479  ;;  %2499 = vpow2.f32 %v1335_v18  ;;  %v1337_v9 = vmul.f32 1.442695, %v1285_v40  ;;  %v1339_v3 = vmul.f32 1.442695, %v1286_v21  ;;  %v741_v47 = vadd.f32 %v2476_v44, %v2470_v57  ;;  %v1252_v20 = vpop.xlane.xlu0 %1251  ;;  %v3481_v57 = vld [vmem:[#allocation17_spill] sm:$0xff] }
 0x17c   : > { %v2482_v52 = vpop.eup %2481  ;;  %2501 = vpow2.f32 %v700_v11  ;;  %984 = vmatprep.mubr.bf16.mxu0 %v791_v4  ;;  %v614_v37 = vpop.xlane.xlu1 %613  ;;  %v1287_v28 = vsub.f32 %v3474_v46, %v1252_v20  ;;  %v1288_v42 = vsub.f32 %v3475_v10, %v1252_v20  ;;  %v1431_v63 = vpack.c.bf16 %v2478_v59, %v3292_v22 }
 0x17d   : > { %v2484_v0 = vpop.eup %2483  ;;  %2503 = vpow2.f32 %v1337_v9  ;;  %1380 = vadd.xlane.f32.xlu0 %v1379_v58  ;;  %742 = vadd.xlane.f32.xlu1 %v741_v47  ;;  %v648_v16 = vsub.f32 %v3476_v43, %v614_v37  ;;  %v649_v49 = vsub.f32 %v3477_v48, %v614_v37  ;;  %v744_v27 = vadd.f32 %v2482_v52, %v3300_v2 }
 0x17e   : > { %v2486_v61 = vpop.eup %2485  ;;  %2505 = vpow2.f32 %v1339_v3  ;;  %985 = vmatmul.mubr.bf16.gmra.mrb[12].mxu0 %v790_v39  ;;  %v1341_v7 = vmul.f32 1.442695, %v1287_v28  ;;  %v1343_v8 = vmul.f32 1.442695, %v1288_v42  ;;  %v1432_v26 = vpack.c.bf16 %v2484_v0, %v2474_v34  ;;  %v3483_v28 = vld [vmem:[#allocation19_spill] sm:$0xff] }
 0x17f   : > { %v3308_v5 = vpop.eup %2487  ;;  %2507 = vpow2.f32 %v702_v19  ;;  %v704_v35 = vmul.f32 1.442695, %v648_v16  ;;  %v706_v6 = vmul.f32 1.442695, %v649_v49  ;;  %v1382_v24 = vadd.f32 %v2484_v0, %v2478_v59  ;;  %v617_v12 = vpop.xlane.xlu0 %616  ;;  %v3482_v59 = vld [vmem:[#allocation18_spill] sm:$0xff]  ;;  %v3484_v0 = vld [vmem:[#allocation20_spill] sm:$0xff] }
 0x180   : > { %v2490_v13 = vpop.eup %2489  ;;  %2509 = vpow2.f32 %v1341_v7  ;;  %1626 = vmatprep.mubr.bf16.mxu1 %v1432_v26  ;;  %v1255_v25 = vpop.xlane.xlu1 %1254  ;;  %v650_v30 = vsub.f32 %v3478_v29, %v617_v12  ;;  %v651_v50 = vsub.f32 %v3479_v31, %v617_v12  ;;  %v792_v51 = vpack.c.bf16 %v2486_v61, %v3300_v2  ;;  %v3485_v16 = vld [vmem:[#allocation21_spill] sm:$0xff]  ;;  %v3486_v12 = vld [vmem:[#allocation22_spill] sm:$0xff] }
 0x181   : > { %v2492_v32 = vpop.eup %2491  ;;  %2511 = vpow2.f32 %v704_v35  ;;  %745 = vadd.xlane.f32.xlu1 %v744_v27  ;;  %1383 = vadd.xlane.f32.xlu0 %v1382_v24  ;;  %v1289_v14 = vsub.f32 %v3480_v56, %v1255_v25  ;;  %v1290_v15 = vsub.f32 %v3481_v57, %v1255_v25  ;;  %v1385_v18 = vadd.f32 %v2490_v13, %v3308_v5  ;;  %v3487_v25 = vld [vmem:[#allocation23_spill] sm:$0xff] }
 0x182   : > { %v2494_v38 = vpop.eup %2493  ;;  %2513 = vpow2.f32 %v706_v6  ;;  %1627 = vmatmul.mubr.bf16.gmra.mrb[12].mxu1 %v1431_v63  ;;  %v708_v22 = vmul.f32 1.442695, %v650_v30  ;;  %v710_v45 = vmul.f32 1.442695, %v651_v50  ;;  %v793_v23 = vpack.c.bf16 %v2492_v32, %v2482_v52 }
 0x183   : > { %v3316_v54 = vpop.eup %2495  ;;  %2515 = vpow2.f32 %v1343_v8  ;;  %v1345_v33 = vmul.f32 1.442695, %v1289_v14  ;;  %v1347_v34 = vmul.f32 1.442695, %v1290_v15  ;;  %v747_v62 = vadd.f32 %v2492_v32, %v2486_v61  ;;  %v1258_v1 = vpop.xlane.xlu0 %1257 }
 0x184   : > { %v2498_v36 = vpop.eup %2497  ;;  %2517 = vpow2.f32 %v708_v22  ;;  %992 = vmatprep.mubr.bf16.mxu0 %v793_v23  ;;  %v620_v39 = vpop.xlane.xlu1 %619  ;;  %v1291_v44 = vsub.f32 %v3184_v55, %v1258_v1  ;;  %v1292_v40 = vsub.f32 %v3187_v60, %v1258_v1  ;;  %v1433_v41 = vpack.c.bf16 %v2494_v38, %v3308_v5 }
 0x185   : > { %v2500_v21 = vpop.eup %2499  ;;  %2519 = vpow2.f32 %v1345_v33  ;;  %1386 = vadd.xlane.f32.xlu0 %v1385_v18  ;;  %748 = vadd.xlane.f32.xlu1 %v747_v62  ;;  %v652_v58 = vsub.f32 %v3194_v53, %v620_v39  ;;  %v653_v11 = vsub.f32 %v3482_v59, %v620_v39  ;;  %v750_v19 = vadd.f32 %v2498_v36, %v3316_v54 }
 0x186   : > { %v2502_v4 = vpop.eup %2501  ;;  %2521 = vpow2.f32 %v1347_v34  ;;  %993 = vmatmul.mubr.bf16.gmra.mrb[16].mxu0 %v792_v51  ;;  %v1349_v2 = vmul.f32 1.442695, %v1291_v44  ;;  %v1351_v9 = vmul.f32 1.442695, %v1292_v40  ;;  %v1434_v55 = vpack.c.bf16 %v2500_v21, %v2490_v13 }
 0x187   : > { %v2504_v3 = vpop.eup %2503  ;;  %2523 = vpow2.f32 %v710_v45  ;;  %v712_v60 = vmul.f32 1.442695, %v652_v58  ;;  %v714_v47 = vmul.f32 1.442695, %v653_v11  ;;  %v1388_v20 = vadd.f32 %v2500_v21, %v2494_v38  ;;  %v623_v52 = vpop.xlane.xlu0 %622 }
 0x188   : > { %v2506_v37 = vpop.eup %2505  ;;  %2525 = vpow2.f32 %v1349_v2  ;;  %1634 = vmatprep.mubr.bf16.mxu1 %v1434_v55  ;;  %v1261_v53 = vpop.xlane.xlu1 %1260  ;;  %v654_v46 = vsub.f32 %v3200_v17, %v623_v52  ;;  %v655_v10 = vsub.f32 %v3483_v28, %v623_v52  ;;  %v794_v42 = vpack.c.bf16 %v2502_v4, %v3316_v54  ;;  %v2393_v52 = vld [vmem:[%s2814_s18] ss:$8 sps:$4 sm:$0xff]   ;;  %v2401_v28 = vld [vmem:[%s2814_s18 + $0x24] ss:$8 sps:$4 sm:$0xff]  }
 0x189   : > { %v2508_v63 = vpop.eup %2507  ;;  %2527 = vpow2.f32 %v712_v60  ;;  %751 = vadd.xlane.f32.xlu1 %v750_v19  ;;  %1389 = vadd.xlane.f32.xlu0 %v1388_v20  ;;  %v1293_v43 = vsub.f32 %v3484_v0, %v1261_v53  ;;  %v1294_v48 = vsub.f32 %v3485_v16, %v1261_v53  ;;  %v1391_v49 = vadd.f32 %v2506_v37, %v2504_v3  ;;  %v2398_v53 = vld [vmem:[%s2814_s18 + $0x14] ss:$8 sps:$4 sm:$0xff]   ;;  %v2407_v0 = vld [vmem:[%s2814_s18 + $0x44] ss:$8 sps:$4 sm:$0xff]  }
 0x18a   : > { %v2510_v27 = vpop.eup %2509  ;;  %2529 = vpow2.f32 %v714_v47  ;;  %1635 = vmatmul.mubr.bf16.gmra.mrb[16].mxu1 %v1433_v41  ;;  %v716_v61 = vmul.f32 1.442695, %v654_v46  ;;  %v718_v7 = vmul.f32 1.442695, %v655_v10  ;;  %v795_v8 = vpack.c.bf16 %v2508_v63, %v2498_v36  ;;  %v2396_v46 = vld [vmem:[%s2814_s18 + $0x10] ss:$8 sps:$4 sm:$0xff]  }
 0x18b   : > { %v2512_v17 = vpop.eup %2511  ;;  %2531 = vpow2.f32 %v1351_v9  ;;  %v1353_v26 = vmul.f32 1.442695, %v1293_v43  ;;  %v1355_v5 = vmul.f32 1.442695, %v1294_v48  ;;  %v753_v35 = vadd.f32 %v2508_v63, %v2502_v4  ;;  %v1264_v6 = vpop.xlane.xlu0 %1263  ;;  %v2399_v10 = vld [vmem:[%s2814_s18 + $0x20] ss:$8 sps:$4 sm:$0xff]  }
 0x18c   : > { %v2514_v24 = vpop.eup %2513  ;;  %2533 = vpow2.f32 %v716_v61  ;;  %1000 = vmatprep.mubr.bf16.mxu0 %v795_v8  ;;  %v1295_v13 = vsub.f32 %v3486_v12, %v1264_v6  ;;  %v1296_v29 = vsub.f32 %v3487_v25, %v1264_v6  ;;  %v1435_v50 = vpack.c.bf16 %v2510_v27, %v2504_v3  ;;  %v2402_v63 = vld [vmem:[%s2814_s18 + $0x30] ss:$8 sps:$4 sm:$0xff]   ;;  %v2405_v43 = vld [vmem:[%s2814_s18 + $0x40] ss:$8 sps:$4 sm:$0xff]   ;;  %v2410_v16 = vld [vmem:[%s2814_s18 + $0x54] ss:$8 sps:$4 sm:$0xff]  }
 0x18d   : > { %v2516_v30 = vpop.eup %2515  ;;  %2535 = vpow2.f32 %v1353_v26  ;;  %1392 = vadd.xlane.f32.xlu0 %v1391_v49  ;;  %754 = vadd.xlane.f32.xlu1 %v753_v35  ;;  %v756_v31 = vadd.f32 %v2514_v24, %v2512_v17  ;;  %v3488_v20 = vmov 0   ;;  %v2413_v61 = vld [vmem:[%s2814_s18 + $0x64] ss:$8 sps:$4 sm:$0xff]   ;;  %v2411_v8 = vld [vmem:[%s2814_s18 + $0x60] ss:$8 sps:$4 sm:$0xff]  }
 0x18e   : > { %v2518_v51 = vpop.eup %2517  ;;  %2537 = vpow2.f32 %v1355_v5  ;;  %1001 = vmatmul.mubr.bf16.gmra.mrb[20].mxu0 %v794_v42  ;;  %v1357_v32 = vmul.f32 1.442695, %v1295_v13  ;;  %v1359_v56 = vmul.f32 1.442695, %v1296_v29  ;;  %v1436_v14 = vpack.c.bf16 %v2516_v30, %v2506_v37  ;;  %v2395_v37 = vld [vmem:[%s2814_s18 + $0x4] ss:$8 sps:$4 sm:$0xff]  }
 0x18f   : > { %v2520_v57 = vpop.eup %2519  ;;  %2539 = vpow2.f32 %v718_v7  ;;  %v1394_v15 = vadd.f32 %v2516_v30, %v2510_v27  ;;  %v796_v33 = vpack.c.bf16 %v2518_v51, %v2512_v17  ;;  %1823 = vmatprep.subr.bf16.mxu0 %v2395_v37  ;;  %2266 = vmatprep.subr.bf16.mxu1 %v2395_v37  ;;  %v2404_v42 = vld [vmem:[%s2814_s18 + $0x34] ss:$8 sps:$4 sm:$0xff]   ;;  %v2408_v27 = vld [vmem:[%s2814_s18 + $0x50] ss:$8 sps:$4 sm:$0xff]  }
 0x190   : > { %v2522_v18 = vpop.eup %2521  ;;  %2541 = vpow2.f32 %v1357_v32  ;;  %1642 = vmatprep.mubr.bf16.mxu1 %v1436_v14  ;;  %1824 = vmatpush1.bf16.msra.mxu0 %v2393_v52  ;;  %v2416_v26 = vld [vmem:[%s2814_s18 + $0x74] ss:$8 sps:$4 sm:$0xff]   ;;  %v2414_v5 = vld [vmem:[%s2814_s18 + $0x70] ss:$8 sps:$4 sm:$0xff]  }
 0x191   : > { %v2524_v38 = vpop.eup %2523  ;;  %2543 = vpow2.f32 %v1359_v56  ;;  %757 = vadd.xlane.f32.xlu1 %v756_v31  ;;  %1395 = vadd.xlane.f32.xlu0 %v1394_v15  ;;  %v1397_v22 = vadd.f32 %v2522_v18, %v2520_v57 }
 0x192   : > { %v2526_v45 = vpop.eup %2525  ;;  %1643 = vmatmul.mubr.bf16.gmra.mrb[20].mxu1 %v1435_v50  ;;  %v797_v23 = vpack.c.bf16 %v2524_v38, %v2514_v24  ;;  %v759_v54 = vadd.f32 %v2524_v38, %v2518_v51  ;;  %1825 = vmatprep.subr.bf16.mxu0 %v2398_v53 }
 0x193   : > { %v2528_v34 = vpop.eup %2527  ;;  %v1437_v41 = vpack.c.bf16 %v2526_v45, %v2520_v57  ;;  %2274 = vmatpush1.bf16.msra.mxu1 %v2393_v52 }
 0x194   : > { %v2530_v62 = vpop.eup %2529  ;;  %1008 = vmatprep.mubr.bf16.mxu0 %v797_v23  ;;  %2267 = vmatprep.subr.bf16.mxu1 %v2398_v53 }
 0x195   : > { %v2532_v1 = vpop.eup %2531  ;;  %1398 = vadd.xlane.f32.xlu0 %v1397_v22  ;;  %760 = vadd.xlane.f32.xlu1 %v759_v54  ;;  %v762_v36 = vadd.f32 %v2530_v62, %v2528_v34 }
 0x196   : > { %v2534_v39 = vpop.eup %2533  ;;  %1009 = vmatmul.mubr.bf16.gmra.mrb[24].mxu0 %v796_v33  ;;  %v1438_v44 = vpack.c.bf16 %v2532_v1, %v2522_v18  ;;  %v1400_v40 = vadd.f32 %v2532_v1, %v2526_v45 }
 0x197   : > { %v2536_v21 = vpop.eup %2535  ;;  %v798_v9 = vpack.c.bf16 %v2534_v39, %v2528_v34  ;;  %1826 = vmatpush1.bf16.msra.mxu0 %v2396_v46  ;;  %2275 = vmatpush1.bf16.msra.mxu1 %v2396_v46 }
 0x198   : > { %v2538_v58 = vpop.eup %2537  ;;  %1650 = vmatprep.mubr.bf16.mxu1 %v1438_v44  ;;  %1827 = vmatprep.subr.bf16.mxu0 %v2401_v28 }
 0x199   : > { %v2540_v59 = vpop.eup %2539  ;;  %763 = vadd.xlane.f32.xlu1 %v762_v36  ;;  %1401 = vadd.xlane.f32.xlu0 %v1400_v40  ;;  %v1403_v11 = vadd.f32 %v2538_v58, %v2536_v21 }
 0x19a   : > { %v2542_v19 = vpop.eup %2541  ;;  %1651 = vmatmul.mubr.bf16.gmra.mrb[24].mxu1 %v1437_v41  ;;  %v799_v4 = vpack.c.bf16 %v2540_v59, %v2530_v62  ;;  %v765_v2 = vadd.f32 %v2540_v59, %v2534_v39  ;;  %2268 = vmatprep.subr.bf16.mxu1 %v2401_v28 }
 0x19b   : > { %v2544_v55 = vpop.eup %2543  ;;  %v1439_v47 = vpack.c.bf16 %v2542_v19, %v2536_v21  ;;  %1828 = vmatpush1.bf16.msra.mxu0 %v2399_v10  ;;  %2276 = vmatpush1.bf16.msra.mxu1 %v2399_v10 }
 0x19c   : > { %1016 = vmatprep.mubr.bf16.mxu0 %v799_v4  ;;  %v1440_v3 = vpack.c.bf16 %v2544_v55, %v2538_v58  ;;  %v1406_v60 = vadd.f32 %v2544_v55, %v2542_v19  ;;  %1829 = vmatprep.subr.bf16.mxu0 %v2404_v42 }
 0x19d   : > { %1404 = vadd.xlane.f32.xlu0 %v1403_v11  ;;  %766 = vadd.xlane.f32.xlu1 %v765_v2 }
 0x19e   : > { %1017 = vmatmul.mubr.bf16.gmra.mrb[28].mxu0 %v798_v9  ;;  %1658 = vmatprep.mubr.bf16.mxu1 %v1440_v3 }
 0x19f   : > { %1855 = vmatprep.mubr.bf16.mxu0 %v3488_v20  ;;  %2269 = vmatprep.subr.bf16.mxu1 %v2404_v42 }
 0x1a0   : > { %1830 = vmatpush1.bf16.msra.mxu0 %v2402_v63  ;;  %2277 = vmatpush1.bf16.msra.mxu1 %v2402_v63 }
 0x1a1   : > { %1407 = vadd.xlane.f32.xlu0 %v1406_v60  ;;  %1831 = vmatprep.subr.bf16.mxu0 %v2407_v0 }
 0x1a2   : > { %1659 = vmatmul.mubr.bf16.gmra.mrb[28].mxu1 %v1439_v47  ;;  %2270 = vmatprep.subr.bf16.mxu1 %v2407_v0 }
 0x1a3   : > { %1865 = vmatprep.mubr.bf16.mxu1 %v3488_v20 }
 0x1a4   : > { %1832 = vmatpush1.bf16.msra.mxu0 %v2405_v43  ;;  %2278 = vmatpush1.bf16.msra.mxu1 %v2405_v43 }
 0x1a5   : > { %1833 = vmatprep.subr.bf16.mxu0 %v2410_v16  ;;  %2271 = vmatprep.subr.bf16.mxu1 %v2410_v16 }
 0x1a8   : > { %1834 = vmatpush1.bf16.msra.mxu0 %v2408_v27  ;;  %2279 = vmatpush1.bf16.msra.mxu1 %v2408_v27 }
 0x1a9   : > { %1835 = vmatprep.subr.bf16.mxu0 %v2413_v61  ;;  %2272 = vmatprep.subr.bf16.mxu1 %v2413_v61 }
 0x1ac   : > { %1836 = vmatpush1.bf16.msra.mxu0 %v2411_v8  ;;  %2280 = vmatpush1.bf16.msra.mxu1 %v2411_v8 }
 0x1ad   : > { %1837 = vmatprep.subr.bf16.mxu0 %v2416_v26  ;;  %2273 = vmatprep.subr.bf16.mxu1 %v2416_v26 }
 0x1b0   : > { %1838 = vmatpush1.bf16.msra.mxu0 %v2414_v5  ;;  %2281 = vmatpush1.bf16.msra.mxu1 %v2414_v5 }
 0x1eb   : > { %v722_v48 = vpop.xlane.xlu1 %721 }
 0x1ec   : > { %2545 = vrcp.f32 %v722_v48 }
 0x1f1   : > { %v725_v7 = vpop.xlane.xlu1 %724 }
 0x1f2   : > { %v1363_v49 = vpop.xlane.xlu0 %1362 }
 0x1f3   : > { %2547 = vrcp.f32 %v1363_v49 }
 0x1f4   : > { %2549 = vrcp.f32 %v725_v7 }
 0x1f5   : > { %v728_v35 = vpop.xlane.xlu1 %727 }
 0x1f6   : > { %v1366_v17 = vpop.xlane.xlu0 %1365  ;;  %v2546_v23 = vpop.eup %2545 }
 0x1f7   : > { %2551 = vrcp.f32 %v1366_v17 }
 0x1f8   : > { %2553 = vrcp.f32 %v728_v35 }
 0x1fa   : > { %v1369_v6 = vpop.xlane.xlu0 %1368  ;;  %v731_v24 = vpop.xlane.xlu1 %730 }
 0x1fb   : > { %2555 = vrcp.f32 %v1369_v6 }
 0x1fc   : > { %2557 = vrcp.f32 %v731_v24 }
 0x1fd   : > { %v2548_v34 = vpop.eup %2547 }
 0x1fe   : > { %v1372_v12 = vpop.xlane.xlu0 %1371  ;;  %v734_v13 = vpop.xlane.xlu1 %733 }
 0x1ff   : > { %v2550_v1 = vpop.eup %2549  ;;  %2559 = vrcp.f32 %v1372_v12 }
 0x200   : > { %2561 = vrcp.f32 %v734_v13 }
 0x201   : > { %v2552_v40 = vpop.eup %2551 }
 0x202   : > { %v1375_v25 = vpop.xlane.xlu0 %1374  ;;  %v737_v29 = vpop.xlane.xlu1 %736 }
 0x203   : > { %2563 = vrcp.f32 %v1375_v25  ;;  %v2554_v52 = vpop.eup %2553 }
 0x204   : > { %2565 = vrcp.f32 %v737_v29 }
 0x205   : > { %v2556_v46 = vpop.eup %2555 }
 0x206   : > { %v1378_v30 = vpop.xlane.xlu0 %1377  ;;  %v3349_v31 = vpop.xlane.xlu1 %739 }
 0x207   : > { %2567 = vrcp.f32 %v1378_v30  ;;  %v2558_v42 = vpop.eup %2557 }
 0x208   : > { %2569 = vrcp.f32 %v3349_v31 }
 0x209   : > { %v2560_v49 = vpop.eup %2559 }
 0x20a   : > { %v3351_v50 = vpop.xlane.xlu0 %1380  ;;  %v3353_v18 = vpop.xlane.xlu1 %742 }
 0x20b   : > { %2571 = vrcp.f32 %v3351_v50  ;;  %v2562_v25 = vpop.eup %2561 }
 0x20c   : > { %2573 = vrcp.f32 %v3353_v18 }
 0x20e   : > { %v3355_v22 = vpop.xlane.xlu0 %1383  ;;  %v3357_v21 = vpop.xlane.xlu1 %745 }
 0x20f   : > { %2575 = vrcp.f32 %v3355_v22 }
 0x210   : > { %2577 = vrcp.f32 %v3357_v21 }
 0x212   : > { %v3359_v4 = vpop.xlane.xlu0 %1386  ;;  %v749_v28 = vpop.xlane.xlu1 %748 }
 0x213   : > { %2579 = vrcp.f32 %v3359_v4 }
 0x214   : > { %2581 = vrcp.f32 %v749_v28 }
 0x216   : > { %v1390_v63 = vpop.xlane.xlu0 %1389  ;;  %v752_v12 = vpop.xlane.xlu1 %751 }
 0x217   : > { %2583 = vrcp.f32 %v1390_v63 }
 0x218   : > { %2585 = vrcp.f32 %v752_v12 }
 0x21a   : > { %v1393_v29 = vpop.xlane.xlu0 %1392 }
 0x21b   : > { %2587 = vrcp.f32 %v1393_v29 }
 0x237   : > { %v2154_v51 = vpop.f32.mrb[0].mxu0 }
 0x238   : > { %v2155_v32 = vpop.f32.mrb[1].mxu0 }
 0x239   : > { %v2156_v56 = vadd.f32 %v2155_v32, %v2154_v51  ;;  %v2157_v14 = vpop.f32.mrb[2].mxu0  ;;  %v2564_v32 = vpop.eup %2563 }
 0x23a   : > { %v2158_v57 = vpop.f32.mrb[3].mxu0 }
 0x23b   : > { %v2159_v15 = vadd.f32 %v2158_v57, %v2157_v14  ;;  %v1025_v36 = vmul.f32 %v2546_v23, %v2156_v56  ;;  %v2566_v14 = vpop.eup %2565 }
 0x23c   : > { %v2218_v38 = vpop.f32.mrb[0].mxu1 }
 0x23d   : > { %v2219_v45 = vpop.f32.mrb[1].mxu1  ;;  %v1026_v58 = vmul.f32 %v2550_v1, %v2159_v15 }
 0x23e   : > { %v2220_v54 = vadd.f32 %v2219_v45, %v2218_v38  ;;  %v2221_v33 = vpop.f32.mrb[2].mxu1  ;;  %v2568_v45 = vpop.eup %2567 }
 0x23f   : > { %v2222_v62 = vpop.f32.mrb[3].mxu1 }
 0x240   : > { %v1667_v39 = vmul.f32 %v2548_v34, %v2220_v54  ;;  %v2223_v44 = vadd.f32 %v2222_v62, %v2221_v33  ;;  %v755_v62 = vpop.xlane.xlu1 %754 }
 0x241   : > { %v2160_v41 = vpop.f32.mrb[4].mxu0  ;;  %2589 = vrcp.f32 %v755_v62 }
 0x242   : > { %v1668_v59 = vmul.f32 %v2552_v40, %v2223_v44  ;;  %v2161_v11 = vpop.f32.mrb[5].mxu0  ;;  %v2319_v19 = vpack.i.bf16 %v1667_v39, %v1025_v36  ;;  %v1396_v36 = vpop.xlane.xlu0 %1395 }
 0x243   : > { %v2162_v2 = vadd.f32 %v2161_v11, %v2160_v41  ;;  %v2163_v9 = vpop.f32.mrb[6].mxu0  ;;  %v2570_v41 = vpop.eup %2569  ;;  %2591 = vrcp.f32 %v1396_v36 }
 0x244   : > { %v2321_v55 = vpack.i.bf16 %v1668_v59, %v1026_v58  ;;  %v2164_v3 = vpop.f32.mrb[7].mxu0  ;;  %2320 = vxpose.xlu1.b32.start [1/16] (narrow) %v2319_v19, 16  ;;  %v2572_v11 = vpop.eup %2571 }
 0x245   : > { %v2165_v60 = vadd.f32 %v2164_v3, %v2163_v9  ;;  %v2224_v47 = vpop.f32.mrb[4].mxu1  ;;  %v1027_v0 = vmul.f32 %v2554_v52, %v2162_v2  ;;  %v2574_v2 = vpop.eup %2573 }
 0x246   : > { %v2225_v20 = vpop.f32.mrb[5].mxu1  ;;  %v1399_v52 = vpop.xlane.xlu0 %1398 }
 0x247   : > { %v2226_v37 = vadd.f32 %v2225_v20, %v2224_v47  ;;  %v2227_v53 = vpop.f32.mrb[6].mxu1  ;;  %v1028_v61 = vmul.f32 %v2558_v42, %v2165_v60  ;;  %v2576_v60 = vpop.eup %2575 }
 0x248   : > { %v2228_v10 = vpop.f32.mrb[7].mxu1  ;;  %2322 = vxpose.xlu1.b32.cont [2/16] (narrow) %v2321_v55, 16  ;;  %v758_v47 = vpop.xlane.xlu1 %757 }
 0x249   : > { %v1669_v43 = vmul.f32 %v2556_v46, %v2226_v37  ;;  %v2229_v16 = vadd.f32 %v2228_v10, %v2227_v53  ;;  %v2166_v48 = vpop.f32.mrb[8].mxu0  ;;  %2593 = vrcp.f32 %v758_v47 }
 0x24a   : > { %v2167_v27 = vpop.f32.mrb[9].mxu0  ;;  %2595 = vrcp.f32 %v1399_v52 }
 0x24b   : > { %v2323_v7 = vpack.i.bf16 %v1669_v43, %v1027_v0  ;;  %v1670_v8 = vmul.f32 %v2560_v49, %v2229_v16  ;;  %v2168_v17 = vadd.f32 %v2167_v27, %v2166_v48  ;;  %v2169_v26 = vpop.f32.mrb[10].mxu0  ;;  %v2578_v16 = vpop.eup %2577 }
 0x24c   : > { %v2170_v5 = vpop.f32.mrb[11].mxu0  ;;  %v2580_v27 = vpop.eup %2579 }
 0x24d   : > { %v2325_v35 = vpack.i.bf16 %v1670_v8, %v1028_v61  ;;  %v2171_v6 = vadd.f32 %v2170_v5, %v2169_v26  ;;  %v2230_v24 = vpop.f32.mrb[8].mxu1  ;;  %2324 = vxpose.xlu1.b32.cont [3/16] (narrow) %v2323_v7, 16  ;;  %v1029_v31 = vmul.f32 %v2562_v25, %v2168_v17  ;;  %v761_v61 = vpop.xlane.xlu1 %760 }
 0x24e   : > { %v2231_v13 = vpop.f32.mrb[9].mxu1  ;;  %v2582_v8 = vpop.eup %2581  ;;  %2597 = vrcp.f32 %v761_v61 }
 0x24f   : > { %v2232_v30 = vadd.f32 %v2231_v13, %v2230_v24  ;;  %v2233_v51 = vpop.f32.mrb[10].mxu1  ;;  %v1030_v23 = vmul.f32 %v2566_v14, %v2171_v6  ;;  %v1402_v17 = vpop.xlane.xlu0 %1401 }
 0x250   : > { %v2234_v56 = vpop.f32.mrb[11].mxu1  ;;  %v2584_v24 = vpop.eup %2583  ;;  %2599 = vrcp.f32 %v1402_v17 }
 0x251   : > { %v1671_v57 = vmul.f32 %v2564_v32, %v2232_v30  ;;  %v2235_v15 = vadd.f32 %v2234_v56, %v2233_v51  ;;  %v2172_v38 = vpop.f32.mrb[12].mxu0  ;;  %2326 = vxpose.xlu1.b32.cont [4/16] (narrow) %v2325_v35, 16 }
 0x252   : > { %v2173_v50 = vpop.f32.mrb[13].mxu0 }
 0x253   : > { %v2327_v54 = vpack.i.bf16 %v1671_v57, %v1029_v31  ;;  %v1672_v33 = vmul.f32 %v2568_v45, %v2235_v15  ;;  %v2174_v34 = vadd.f32 %v2173_v50, %v2172_v38  ;;  %v2175_v18 = vpop.f32.mrb[14].mxu0  ;;  %v764_v57 = vpop.xlane.xlu1 %763 }
 0x254   : > { %v2176_v1 = vpop.f32.mrb[15].mxu0  ;;  %v2586_v38 = vpop.eup %2585  ;;  %2601 = vrcp.f32 %v764_v57 }
 0x255   : > { %v2329_v22 = vpack.i.bf16 %v1672_v33, %v1030_v23  ;;  %v2177_v39 = vadd.f32 %v2176_v1, %v2175_v18  ;;  %v2236_v44 = vpop.f32.mrb[12].mxu1  ;;  %2328 = vxpose.xlu1.b32.cont [5/16] (narrow) %v2327_v54, 16  ;;  %v1031_v9 = vmul.f32 %v2570_v41, %v2174_v34  ;;  %v1405_v45 = vpop.xlane.xlu0 %1404 }
 0x256   : > { %v2237_v40 = vpop.f32.mrb[13].mxu1  ;;  %v2588_v54 = vpop.eup %2587  ;;  %2603 = vrcp.f32 %v1405_v45 }
 0x257   : > { %v2238_v58 = vadd.f32 %v2237_v40, %v2236_v44  ;;  %v2239_v59 = vpop.f32.mrb[14].mxu1  ;;  %v1032_v37 = vmul.f32 %v2574_v2, %v2177_v39  ;;  %v2590_v34 = vpop.eup %2589 }
 0x258   : > { %v2240_v19 = vpop.f32.mrb[15].mxu1 }
 0x259   : > { %v1673_v55 = vmul.f32 %v2572_v11, %v2238_v58  ;;  %v2241_v3 = vadd.f32 %v2240_v19, %v2239_v59  ;;  %v2178_v21 = vpop.f32.mrb[16].mxu0  ;;  %2330 = vxpose.xlu1.b32.cont [6/16] (narrow) %v2329_v22, 16  ;;  %v2592_v22 = vpop.eup %2591 }
 0x25a   : > { %v2179_v20 = vpop.f32.mrb[17].mxu0  ;;  %v767_v11 = vpop.xlane.xlu1 %766 }
 0x25b   : > { %v2331_v4 = vpack.i.bf16 %v1673_v55, %v1031_v9  ;;  %v1674_v53 = vmul.f32 %v2576_v60, %v2241_v3  ;;  %v2180_v46 = vadd.f32 %v2179_v20, %v2178_v21  ;;  %v2181_v28 = vpop.f32.mrb[18].mxu0  ;;  %v1408_v2 = vpop.xlane.xlu0 %1407  ;;  %2605 = vrcp.f32 %v767_v11  ;;  %v1724_v11 = vld [vmem:[#allocation4 + $0x38] sm:$0xff] }
 0x25c   : > { %v2182_v10 = vpop.f32.mrb[19].mxu0  ;;  %v2594_v60 = vpop.eup %2593  ;;  %2607 = vrcp.f32 %v1408_v2 }
 0x25d   : > { %v2333_v42 = vpack.i.bf16 %v1674_v53, %v1032_v37  ;;  %v2183_v63 = vadd.f32 %v2182_v10, %v2181_v28  ;;  %v2242_v0 = vpop.f32.mrb[16].mxu1  ;;  %2332 = vxpose.xlu1.b32.cont [7/16] (narrow) %v2331_v4, 16  ;;  %v1033_v26 = vmul.f32 %v2578_v16, %v2180_v46  ;;  %v2596_v52 = vpop.eup %2595 }
 0x25e   : > { %v2243_v43 = vpop.f32.mrb[17].mxu1  ;;  %v2598_v4 = vpop.eup %2597 }
 0x25f   : > { %v2244_v48 = vadd.f32 %v2243_v43, %v2242_v0  ;;  %v2245_v49 = vpop.f32.mrb[18].mxu1  ;;  %v1034_v13 = vmul.f32 %v2582_v8, %v2183_v63 }
 0x260   : > { %v2246_v7 = vpop.f32.mrb[19].mxu1 }
 0x261   : > { %v1675_v5 = vmul.f32 %v2580_v27, %v2244_v48  ;;  %v2247_v35 = vadd.f32 %v2246_v7, %v2245_v49  ;;  %v2184_v6 = vpop.f32.mrb[20].mxu0  ;;  %2334 = vxpose.xlu1.b32.cont [8/16] (narrow) %v2333_v42, 16  ;;  %v2600_v42 = vpop.eup %2599 }
 0x262   : > { %v2185_v12 = vpop.f32.mrb[21].mxu0 }
 0x263   : > { %v2335_v25 = vpack.i.bf16 %v1675_v5, %v1033_v26  ;;  %v1676_v29 = vmul.f32 %v2584_v24, %v2247_v35  ;;  %v2186_v30 = vadd.f32 %v2185_v12, %v2184_v6  ;;  %v2187_v51 = vpop.f32.mrb[22].mxu0  ;;  %v2602_v26 = vpop.eup %2601 }
 0x264   : > { %v2188_v32 = vpop.f32.mrb[23].mxu0  ;;  %v2604_v6 = vpop.eup %2603 }
 0x265   : > { %v2337_v56 = vpack.i.bf16 %v1676_v29, %v1034_v13  ;;  %v2189_v14 = vadd.f32 %v2188_v32, %v2187_v51  ;;  %v2248_v31 = vpop.f32.mrb[20].mxu1  ;;  %2336 = vxpose.xlu1.b32.cont [9/16] (narrow) %v2335_v25, 16  ;;  %v1035_v18 = vmul.f32 %v2586_v38, %v2186_v30  ;;  %v2606_v12 = vpop.eup %2605 }
 0x266   : > { %v2249_v15 = vpop.f32.mrb[21].mxu1  ;;  %v2608_v30 = vpop.eup %2607 }
 0x267   : > { %v2250_v50 = vadd.f32 %v2249_v15, %v2248_v31  ;;  %v2251_v23 = vpop.f32.mrb[22].mxu1  ;;  %v1036_v44 = vmul.f32 %v2590_v34, %v2189_v14  ;;  %v1721_v34 = vld [vmem:[#allocation4 + $0x20] sm:$0xff] }
 0x268   : > { %v2252_v33 = vpop.f32.mrb[23].mxu1 }
 0x269   : > { %v1677_v62 = vmul.f32 %v2588_v54, %v2250_v50  ;;  %v2253_v1 = vadd.f32 %v2252_v33, %v2251_v23  ;;  %v2190_v36 = vpop.f32.mrb[24].mxu0  ;;  %2338 = vxpose.xlu1.b32.cont [10/16] (narrow) %v2337_v56, 16  ;;  %v1717_v33 = vld [vmem:[#allocation4] sm:$0xff] }
 0x26a   : > { %v2191_v39 = vpop.f32.mrb[25].mxu0 }
 0x26b   : > { %v2339_v40 = vpack.i.bf16 %v1677_v62, %v1035_v18  ;;  %v1678_v41 = vmul.f32 %v2592_v22, %v2253_v1  ;;  %v2192_v58 = vadd.f32 %v2191_v39, %v2190_v36  ;;  %v2193_v59 = vpop.f32.mrb[26].mxu0  ;;  %v1718_v18 = vld [vmem:[#allocation4 + $0x8] sm:$0xff]  ;;  %v1719_v22 = vld [vmem:[#allocation4 + $0x10] sm:$0xff] }
 0x26c   : > { %v2194_v19 = vpop.f32.mrb[27].mxu0  ;;  %v1722_v62 = vld [vmem:[#allocation4 + $0x28] sm:$0xff]  ;;  %v1723_v39 = vld [vmem:[#allocation4 + $0x30] sm:$0xff] }
 0x26d   : > { %v2341_v9 = vpack.i.bf16 %v1678_v41, %v1036_v44  ;;  %v2195_v55 = vadd.f32 %v2194_v19, %v2193_v59  ;;  %v2254_v3 = vpop.f32.mrb[24].mxu1  ;;  %2340 = vxpose.xlu1.b32.cont [11/16] (narrow) %v2339_v40, 16  ;;  %v1037_v53 = vmul.f32 %v2594_v60, %v2192_v58  ;;  %v1720_v59 = vld [vmem:[#allocation4 + $0x18] sm:$0xff] }
 0x26e   : > { %v2255_v21 = vpop.f32.mrb[25].mxu1 }
 0x26f   : > { %v2256_v47 = vadd.f32 %v2255_v21, %v2254_v3  ;;  %v2257_v20 = vpop.f32.mrb[26].mxu1  ;;  %v1038_v0 = vmul.f32 %v2598_v4, %v2195_v55  ;;  %v1904_v4 = vld [vmem:[%s3435_s5] sm:$0x3] (!%p2131_p10) }
 0x270   : > { %v2258_v37 = vpop.f32.mrb[27].mxu1 }
 0x271   : > { %v1679_v46 = vmul.f32 %v2596_v52, %v2256_v47  ;;  %v2259_v28 = vadd.f32 %v2258_v37, %v2257_v20  ;;  %v2196_v10 = vpop.f32.mrb[28].mxu0  ;;  %2342 = vxpose.xlu1.b32.cont [12/16] (narrow) %v2341_v9, 16 }
 0x272   : > { %v2197_v63 = vpop.f32.mrb[29].mxu0 }
 0x273   : > { %v2343_v43 = vpack.i.bf16 %v1679_v46, %v1037_v53  ;;  %v1680_v16 = vmul.f32 %v2600_v42, %v2259_v28  ;;  %v2198_v48 = vadd.f32 %v2197_v63, %v2196_v10  ;;  %v2199_v49 = vpop.f32.mrb[30].mxu0  ;;  %v1924_v53 = vld [vmem:[%s3433_s3] sm:$0xff] (!%p2131_p10)  ;;  %v3490_v42 = vld [vmem:[#allocation8_spill] sm:$0xff] (!%p2131_p10) }
 0x274   : > { %v2200_v27 = vpop.f32.mrb[31].mxu0  ;;  %v3489_v46 = vld [vmem:[#allocation7_spill] sm:$0xff] (!%p2131_p10)  ;;  %v1913_v63 = vrot.slane (!%p2131_p10), %v1904_v4, %v3490_v42 }
 0x275   : > { %v2345_v61 = vpack.i.bf16 %v1680_v16, %v1038_v0  ;;  %v2201_v7 = vadd.f32 %v2200_v27, %v2199_v49  ;;  %v2260_v8 = vpop.f32.mrb[28].mxu1  ;;  %2344 = vxpose.xlu1.b32.cont [13/16] (narrow) %v2343_v43, 16  ;;  %v1039_v13 = vmul.f32 %v2602_v26, %v2198_v48  ;;  %v1909_v28 = vrot.slane (!%p2131_p10), %v1904_v4, %v3489_v46  ;;  %v1925_v0 = vld [vmem:[%s3433_s3 + $0x8] sm:$0xff] (!%p2131_p10)  ;;  %v1926_v16 = vld [vmem:[%s3433_s3 + $0x10] sm:$0xff] (!%p2131_p10)  ;;  %v1927_v49 = vld [vmem:[%s3433_s3 + $0x18] sm:$0xff] (!%p2131_p10) }
 0x276   : > { %v2261_v17 = vpop.f32.mrb[29].mxu1  ;;  %v1928_v26 = vld [vmem:[%s3433_s3 + $0x20] sm:$0xff] (!%p2131_p10) }
 0x277   : > { %v2262_v5 = vadd.f32 %v2261_v17, %v2260_v8  ;;  %v2263_v35 = vpop.f32.mrb[30].mxu1  ;;  %v1040_v51 = vmul.f32 %v2606_v12, %v2201_v7 }
 0x278   : > { %v2264_v24 = vpop.f32.mrb[31].mxu1 }
 0x279   : > { %v1681_v25 = vmul.f32 %v2604_v6, %v2262_v5  ;;  %v2265_v29 = vadd.f32 %v2264_v24, %v2263_v35  ;;  %2346 = vxpose.xlu1.b32.cont [14/16] (narrow) %v2345_v61, 16  ;;  %v1929_v24 = vld [vmem:[%s3433_s3 + $0x28] sm:$0xff] (!%p2131_p10) }
 0x27b   : > { %v2347_v32 = vpack.i.bf16 %v1681_v25, %v1039_v13  ;;  %v1682_v56 = vmul.f32 %v2608_v30, %v2265_v29 }
 0x27d   : > { %v2349_v14 = vpack.i.bf16 %v1682_v56, %v1040_v51  ;;  %2348 = vxpose.xlu1.b32.cont [15/16] (narrow) %v2347_v32, 16  ;;  %v1930_v51 = vld [vmem:[%s3433_s3 + $0x30] sm:$0xff] (!%p2131_p10)  ;;  %v1931_v56 = vld [vmem:[%s3433_s3 + $0x38] sm:$0xff] (!%p2131_p10) }
 0x281   : > { %2350 = vxpose.xlu1.b32.end [16/16] (narrow) %v2349_v14, 16 }
 0x2c5   : > { %v2351_v31 = vpop.trf.xlu1 }
 0x2c6   : > { %v2355_v57 = vunpack.i.h.bf16 %v2351_v31  ;;  %v2352_v15 = vunpack.i.l.bf16 %v2351_v31 }
 0x2c9   : > { %v2356_v38 = vpop.trf.xlu1 }
 0x2ca   : > { %v2360_v45 = vunpack.i.h.bf16 %v2356_v38  ;;  %v2357_v50 = vunpack.i.l.bf16 %v2356_v38 }
 0x2cc   : > { %v1073_v23 = vpack.c.bf16 %v2357_v50, %v2352_v15  ;;  %v1715_v54 = vpack.c.bf16 %v2360_v45, %v2355_v57 }
 0x2ce   : > { %1856 = vmatmul.mubr.bf16.vlgmr.msra.gmra.mrb[32].mxu0 %v1073_v23  ;;  %1866 = vmatmul.mubr.bf16.vlgmr.msra.gmra.mrb[32].mxu1 %v1715_v54 }
 0x3a1   : > { %v1857_v1 = vpop.f32.mrb[32].mxu0  ;;  %v1867_v36 = vpop.f32.mrb[32].mxu1  ;;  %1895 = sbr.rel (%p2131_p10) target bundleno = 951 (0x3b7), region = 90 }
 0x3a2   : > { %v1876_v44 = vadd.f32 %v1857_v1, %v1717_v33  ;;  %v1880_v40 = vadd.f32 %v1867_v36, %v1721_v34  ;;  %v1859_v41 = vpop.f32.mrb[33].mxu0  ;;  %v1869_v58 = vpop.f32.mrb[33].mxu1 }
 0x3a3   : > { %v1877_v19 = vadd.f32 %v1859_v41, %v1718_v18  ;;  %v1881_v2 = vadd.f32 %v1869_v58, %v1722_v62  ;;  %v1861_v9 = vpop.f32.mrb[34].mxu0  ;;  %v1871_v55 = vpop.f32.mrb[34].mxu1 }
 0x3a4   : > { %1884 = vst [vmem:[#allocation4] sm:$0xff] %v1876_v44  ;;  %1888 = vst [vmem:[#allocation4 + $0x20] sm:$0xff] %v1880_v40  ;;  %v1878_v3 = vadd.f32 %v1861_v9, %v1719_v22  ;;  %v1882_v21 = vadd.f32 %v1871_v55, %v1723_v39  ;;  %v1863_v60 = vpop.f32.mrb[35].mxu0  ;;  %v1873_v47 = vpop.f32.mrb[35].mxu1 }
 0x3a5   : > { %1885 = vst [vmem:[#allocation4 + $0x8] sm:$0xff] %v1877_v19  ;;  %1889 = vst [vmem:[#allocation4 + $0x28] sm:$0xff] %v1881_v2  ;;  %v1879_v20 = vadd.f32 %v1863_v60, %v1720_v59  ;;  %v1883_v52 = vadd.f32 %v1873_v47, %v1724_v11 }
 0x3a6   : > { %1886 = vst [vmem:[#allocation4 + $0x10] sm:$0xff] %v1878_v3  ;;  %1890 = vst [vmem:[#allocation4 + $0x30] sm:$0xff] %v1882_v21 }
 0x3a7   : > { %1887 = vst [vmem:[#allocation4 + $0x18] sm:$0xff] %v1879_v20  ;;  %1891 = vst [vmem:[#allocation4 + $0x38] sm:$0xff] %v1883_v52 }
 0x3ab   : > { %v1896_v37 = vld [vmem:[#allocation4] sm:$0xff] }
 0x3ac   : > { %v1897_v10 = vld [vmem:[#allocation4 + $0x8] sm:$0xff]  ;;  %v1916_v27 = vadd.f32 %v1909_v28, %v1896_v37  ;;  %v1900_v17 = vld [vmem:[#allocation4 + $0x20] sm:$0xff] }
 0x3ad   : > { %v1898_v43 = vld [vmem:[#allocation4 + $0x10] sm:$0xff]  ;;  %v1917_v61 = vadd.f32 %v1913_v63, %v1897_v10  ;;  %v1901_v5 = vld [vmem:[#allocation4 + $0x28] sm:$0xff]  ;;  %v1920_v35 = vadd.f32 %v1909_v28, %v1900_v17 }
 0x3ae   : > { %v1899_v48 = vld [vmem:[#allocation4 + $0x18] sm:$0xff]  ;;  %v1918_v7 = vadd.f32 %v1909_v28, %v1898_v43  ;;  %v1921_v6 = vadd.f32 %v1913_v63, %v1901_v5  ;;  %v1902_v12 = vld [vmem:[#allocation4 + $0x30] sm:$0xff]  ;;  %v1932_v13 = vadd.f32 %v1924_v53, %v1916_v27 }
 0x3af   : > { %v1919_v8 = vadd.f32 %v1913_v63, %v1899_v48  ;;  %v1933_v25 = vadd.f32 %v1925_v0, %v1917_v61  ;;  %v1903_v32 = vld [vmem:[#allocation4 + $0x38] sm:$0xff]  ;;  %v1936_v14 = vadd.f32 %v1928_v26, %v1920_v35  ;;  %v1922_v57 = vadd.f32 %v1909_v28, %v1902_v12 }
 0x3b0   : > { %v1934_v29 = vadd.f32 %v1926_v16, %v1918_v7  ;;  %v1937_v31 = vadd.f32 %v1929_v24, %v1921_v6  ;;  %v1923_v15 = vadd.f32 %v1913_v63, %v1903_v32  ;;  %v1940_v38 = vmax.f32 %v1932_v13, 0.0 }
 0x3b1   : > { %v1935_v30 = vadd.f32 %v1927_v49, %v1919_v8  ;;  %v1941_v45 = vmax.f32 %v1933_v25, 0.0  ;;  %v1944_v54 = vmax.f32 %v1936_v14, 0.0  ;;  %v1938_v34 = vadd.f32 %v1930_v51, %v1922_v57 }
 0x3b2   : > { %v1942_v50 = vmax.f32 %v1934_v29, 0.0  ;;  %v1945_v33 = vmax.f32 %v1937_v31, 0.0  ;;  %v1939_v18 = vadd.f32 %v1931_v56, %v1923_v15  ;;  %1948 = vst [vmem:[#allocation4] sm:$0xff] %v1940_v38 }
 0x3b3   : > { %v1943_v23 = vmax.f32 %v1935_v30, 0.0  ;;  %1949 = vst [vmem:[#allocation4 + $0x8] sm:$0xff] %v1941_v45  ;;  %1952 = vst [vmem:[#allocation4 + $0x20] sm:$0xff] %v1944_v54  ;;  %v1946_v62 = vmax.f32 %v1938_v34, 0.0 }
 0x3b4   : > { %1950 = vst [vmem:[#allocation4 + $0x10] sm:$0xff] %v1942_v50  ;;  %1953 = vst [vmem:[#allocation4 + $0x28] sm:$0xff] %v1945_v33  ;;  %v1947_v1 = vmax.f32 %v1939_v18, 0.0 }
 0x3b5   : > { %1951 = vst [vmem:[#allocation4 + $0x18] sm:$0xff] %v1943_v23  ;;  %1954 = vst [vmem:[#allocation4 + $0x30] sm:$0xff] %v1946_v62 }
 0x3b6   : > { %1955 = vst [vmem:[#allocation4 + $0x38] sm:$0xff] %v1947_v1 }
 0x3b7 PF: > { %p2286_p11 = scmp.eq.s32.totalorder %s2719_s24, 1  ;;  %s2665_s9 = smov [#allocation4]  }
 0x3b8   : > { %s1962_s10 = sshll.u32 %s2665_s9, 4  ;;  %s1963_s10 = int_to_ptr.vmem [resolvable:$true] %s1962_s10 }
 0x3b9   : > { %s2609_s18 = scalar_lea.vmem %s1963_s10, 1024  ;;  %p2616_p1 = scmp.lt.s32.totalorder %s1963_s10, %s1963_s10 }
 0x3ba   : > { %p2610_p12 = scmp.ne.s32.totalorder %s1963_s10, %s2609_s18  ;;  %p2617_p2 = scmp.lt.s32.totalorder %s2609_s18, %s2609_s18 }
 0x3bc   : > { %p2611_p13 = pnand %p2610_p12, %p2286_p11  ;;  %p2618_p3 = por %p2617_p2, %p2616_p1 }
 0x3be   : > { %p2612_p0 = pneg %p2611_p13 }
 0x3c0   : > { %p2619_p4 = pnand %p2618_p3, %p2612_p0 }
 0x3c2   : > { %2622 = shalt.err (!%p2619_p4)
}
 0x3c3   : > { %s2623_s13 = scalar_lea.hbm %s3436_s6, 1024 }
 0x3c4   : > { %p2624_p5 = scmp.ne.s32.totalorder %s3436_s6, %s2623_s13  ;;  %p2629_p8 = scmp.lt.u32.totalorder %s2623_s13, %s3436_s6 }
 0x3c6   : > { %p2625_p6 = pnand %p2624_p5, %p2286_p11 }
 0x3c8   : > { %p2626_p7 = pneg %p2625_p6 }
 0x3ca   : > { %p2631_p9 = pnand %p2629_p8, %p2626_p7 }
 0x3cc   : > { %2634 = shalt.err (!%p2631_p9)
}
 0x3cd   : > { %s2666_s19 = smov 256   ;;  %s2667_s20 = smov 16  }
 0x3ce   : > { %2283 = dma.vmem_to_hbm [thread:$0]  (%p2286_p11), %s1963_s10, 1024, %s3436_s6, [#allocation5], %s2666_s19, %s2666_s19, %s2667_s20  }
 0x3cf   : > { %2648 = dma.done.wait (%p2286_p11), [#allocation5], 1024  }
 0x3d0   : > { %2650 = vsyncadd (%p2286_p11), [#allocation5], 4294966272 }
 0x3d1 PF: > { %p14_p10 = scmp.ge.s32.totalorder %s2722_s25, 4   ;;  %s3491_s21 = smov %s2657_s22 }
 0x3d2   : > { %s3492_s22 = smov %s2731_s28  ;;  %s3493_s23 = smov %s2722_s25 }
 0x3d3   :  { %16 = sbr.rel (!%p14_p10) target bundleno = 2 (0x2), region = 128 }
 0x3da   :  { %1978 = vsyncpa [#allocation5], 1 }
 0x3db   :  { %1980 = vsyncpa [#allocation5 + $0x1], 1 }

</bundles_post_ra>
